<compile_context>
chip_gen: v6e
topology: v6e:2x2x1
jax: 0.10.0
libtpu: 0.0.40
codegen_flags: <defaults>
</compile_context>

<pallas_src>
import functools
import math

import jax
import jax.numpy as jnp
from jax.experimental import pallas as pl
from jax.experimental.pallas import tpu as pltpu

LEAKY_SLOPE = 0.01
BN_EPS = 1e-5
LANE = 128


def _leaky_relu(z):
    return jnp.where(z >= 0, z, LEAKY_SLOPE * z)


def _round_up(n, m):
    return ((n + m - 1) // m) * m


# -----------------------------------------------------------------------------
# Kernel
# -----------------------------------------------------------------------------
def crop_mlp_kernel(out_widths, bias_offsets, x_ref, *refs):
    """Fused 8-layer MLP forward on one batch tile.

    refs = (w1..w8, bias_pack_ref, out_ref). Weights are bf16 (in, out);
    bias_pack is a single (1, total) f32 row with 128-aligned segments.
    """
    n_layers = len(out_widths)
    w_refs = refs[:n_layers]
    bias_ref = refs[n_layers]
    out_ref = refs[n_layers + 1]

    h = x_ref[...]  # (tile_b, in_features) bf16
    for l in range(n_layers):
        off, width = bias_offsets[l], out_widths[l]
        b = bias_ref[:, off:off + width]  # (1, width) f32, broadcasts over batch
        z = jnp.dot(h, w_refs[l][...], preferred_element_type=jnp.float32) + b
        if l < n_layers - 1:
            # LeakyReLU (Dropout in eval mode is identity; BN already folded).
            h = _leaky_relu(z).astype(jnp.bfloat16)
        else:
            # Final Linear -> lane-dense 128-wide logits slab.
            out_ref[...] = z.astype(out_ref.dtype)


# -----------------------------------------------------------------------------
# Parameter construction / preparation
# -----------------------------------------------------------------------------
def make_crop_mlp_params(key, input_size=64, output_size=4):
    """Deterministic parameter init matching CropMLP's layer shapes.

    Weights are stored (in_features, out_features), i.e. transposed vs nn.Linear.
    """
    dims = [
        input_size, 16 * input_size, 8 * input_size, 4 * input_size,
        2 * input_size, input_size, input_size // 2, input_size // 8, output_size,
    ]
    n_layers = len(dims) - 1  # 8 Linear layers
    keys = jax.random.split(key, 2 * n_layers + 4 * 3)
    k = 0

    weights, biases = [], []
    for l in range(n_layers):
        fan_in, fan_out = dims[l], dims[l + 1]
        bound = 1.0 / math.sqrt(fan_in)
        w = jax.random.uniform(keys[k], (fan_in, fan_out), jnp.float32, -bound, bound); k += 1
        b = jax.random.uniform(keys[k], (1, fan_out), jnp.float32, -bound, bound); k += 1
        weights.append(w)
        biases.append(b)

    # BatchNorm params for the first 3 hidden widths (eval-mode running stats).
    bn_scales, bn_shifts = [], []
    for l in range(3):
        width = dims[l + 1]
        gamma = 1.0 + 0.1 * jax.random.normal(keys[k], (1, width), jnp.float32); k += 1
        beta = 0.1 * jax.random.normal(keys[k], (1, width), jnp.float32); k += 1
        running_mean = 0.1 * jax.random.normal(keys[k], (1, width), jnp.float32); k += 1
        running_var = jnp.abs(
            1.0 + 0.1 * jax.random.normal(keys[k], (1, width), jnp.float32)); k += 1
        scale = gamma / jnp.sqrt(running_var + BN_EPS)
        shift = beta - running_mean * scale
        bn_scales.append(scale)
        bn_shifts.append(shift)

    return weights, biases, bn_scales, bn_shifts


def prepare_inference_params(weights, biases, bn_scales, bn_shifts):
    """Fold eval-mode BN into the following Linear, pad the final layer to 128
    lanes, coalesce biases, and cast weights to bf16.

    Returns (weights_bf16, bias_pack_f32, folded_w_f32, folded_b_f32).
    """
    w = [jnp.asarray(W, jnp.float32) for W in weights]
    b = [jnp.asarray(B, jnp.float32).reshape(1, -1) for B in biases]

    # y_bn = leaky(.)*s + t; next Linear: y_bn @ W + b = leaky(.) @ (diag(s)W) + (t@W + b)
    for l in range(3):
        s = bn_scales[l].reshape(-1)
        t = bn_shifts[l].reshape(1, -1)
        nxt = l + 1
        b[nxt] = b[nxt] + t @ w[nxt]        # uses the ORIGINAL next-layer W
        w[nxt] = s[:, None] * w[nxt]

    # Pad final layer to a lane-dense 128-wide output.
    out = w[-1].shape[1]
    out_pad = _round_up(out, LANE)
    if out_pad != out:
        w[-1] = jnp.pad(w[-1], ((0, 0), (0, out_pad - out)))
        b[-1] = jnp.pad(b[-1], ((0, 0), (0, out_pad - out)))

    # Coalesce all biases into one lane-aligned (1, total) f32 row.
    offsets, off = [], 0
    for W in w:
        offsets.append(off)
        off += _round_up(W.shape[1], LANE)
    bias_pack = jnp.zeros((1, off), jnp.float32)
    for l, B in enumerate(b):
        bias_pack = bias_pack.at[:, offsets[l]:offsets[l] + B.shape[1]].set(B)

    weights_bf16 = [W.astype(jnp.bfloat16) for W in w]
    return weights_bf16, bias_pack, w, b


# -----------------------------------------------------------------------------
# Pallas wrapper
# -----------------------------------------------------------------------------
@functools.partial(jax.jit, static_argnames=("output_size",))
def crop_mlp_forward(x, weights, bias_pack, *, output_size):
    batch, in_features = x.shape
    n_layers = len(weights)

    out_widths = tuple(int(W.shape[1]) for W in weights)
    bias_offsets, off = [], 0
    for wd in out_widths:
        bias_offsets.append(off)
        off += _round_up(wd, LANE)
    bias_offsets = tuple(bias_offsets)
    out_pad = out_widths[-1]

    # Batch tiling: up to 256 rows per tile (MXU-friendly on v6e/v7x), pad batch.
    tile_b = min(256, _round_up(batch, 8))
    padded_batch = _round_up(batch, tile_b)
    if padded_batch != batch:
        x = jnp.pad(x, ((0, padded_batch - batch), (0, 0)))
    x = x.astype(jnp.bfloat16)

    grid = (padded_batch // tile_b,)

    x_spec = pl.BlockSpec((tile_b, in_features), lambda i: (i, 0))
    # Constant block index -> weights/biases fetched once, stay VMEM-resident.
    w_specs = [pl.BlockSpec(W.shape, lambda i: (0, 0)) for W in weights]
    bias_spec = pl.BlockSpec(bias_pack.shape, lambda i: (0, 0))
    out_spec = pl.BlockSpec((tile_b, out_pad), lambda i: (i, 0))

    kernel = functools.partial(crop_mlp_kernel, out_widths, bias_offsets)

    out = pl.pallas_call(
        kernel,
        out_shape=jax.ShapeDtypeStruct((padded_batch, out_pad), jnp.float32),
        grid=grid,
        in_specs=[x_spec] + w_specs + [bias_spec],
        out_specs=out_spec,
        compiler_params=pltpu.CompilerParams(
            dimension_semantics=("parallel",),      # megacore batch sharding on v7x
            vmem_limit_bytes=16 * 1024 * 1024,
        ),
    )(x, *weights, bias_pack)

    return out[:batch, :output_size]


# -----------------------------------------------------------------------------
# Plain-JAX references
# -----------------------------------------------------------------------------
def _forward_ref(x, weights, biases, act_cast=None):
    """Forward with already-folded params; mirrors the kernel's cast pattern."""
    h = x.astype(jnp.float32)
    n = len(weights)
    for l in range(n):
        lhs = h.astype(act_cast) if act_cast is not None else h
        z = jnp.dot(lhs, weights[l], preferred_element_type=jnp.float32) + biases[l]
        h = _leaky_relu(z) if l < n - 1 else z
    return h


def crop_mlp_reference_orig(x, weights, biases, bn_scales, bn_shifts):
    """Original (unfolded) eval-mode forward: Linear->LeakyReLU->BN x3, etc."""
    h = x
    for l in range(8):
        z = h @ weights[l] + biases[l]
        if l < 7:
            h = _leaky_relu(z)
            if l < 3:
                h = h * bn_scales[l] + bn_shifts[l]
        else:
            h = z
    return h


# -----------------------------------------------------------------------------
if __name__ == "__main__":
    INPUT_SIZE = 64    # CropMLP(input_size=64): widths 1024/512/256/128/64/32/8 -> 4
    OUTPUT_SIZE = 4
    BATCH = 8

    key = jax.random.PRNGKey(0)
    key_x, key_p = jax.random.split(key)

    x = jax.random.normal(key_x, (BATCH, INPUT_SIZE), dtype=jnp.float32)
    weights, biases, bn_scales, bn_shifts = make_crop_mlp_params(
        key_p, input_size=INPUT_SIZE, output_size=OUTPUT_SIZE
    )

    weights_bf16, bias_pack, folded_w_f32, folded_b_f32 = prepare_inference_params(
        weights, biases, bn_scales, bn_shifts
    )

    out = crop_mlp_forward(x, weights_bf16, bias_pack, output_size=OUTPUT_SIZE)
    out = jax.block_until_ready(out)
    assert out.shape == (BATCH, OUTPUT_SIZE), out.shape

    # (a) BN-fold exactness (f32 folded path vs original f32 path).
    ref_orig = crop_mlp_reference_orig(x, weights, biases, bn_scales, bn_shifts)
    ref_fold = _forward_ref(x, folded_w_f32, folded_b_f32)[:, :OUTPUT_SIZE]
    assert jnp.allclose(ref_fold, ref_orig, atol=2e-3, rtol=2e-3), (
        float(jnp.max(jnp.abs(ref_fold - ref_orig)))
    )

    # (b) Kernel vs matched bf16 reference (same dtypes / op sequence).
    ref_bf16 = _forward_ref(
        x, weights_bf16, folded_b_f32, act_cast=jnp.bfloat16
    )[:, :OUTPUT_SIZE]
    assert jnp.allclose(out, ref_bf16, atol=1e-2, rtol=1e-2), (
        float(jnp.max(jnp.abs(out - ref_bf16)))
    )

    print("KERNEL_OK")
</pallas_src>

<mosaic_0001>
module attributes {stable_mosaic.version = 11 : i64} {
  func.func @crop_mlp_kernel(%arg0: i32, %arg1: memref<8x64xbf16, #tpu.memory_space<vmem>>, %arg2: memref<64x1024xbf16, #tpu.memory_space<vmem>>, %arg3: memref<1024x512xbf16, #tpu.memory_space<vmem>>, %arg4: memref<512x256xbf16, #tpu.memory_space<vmem>>, %arg5: memref<256x128xbf16, #tpu.memory_space<vmem>>, %arg6: memref<128x64xbf16, #tpu.memory_space<vmem>>, %arg7: memref<64x32xbf16, #tpu.memory_space<vmem>>, %arg8: memref<32x8xbf16, #tpu.memory_space<vmem>>, %arg9: memref<8x128xbf16, #tpu.memory_space<vmem>>, %arg10: memref<1x2432xf32, #tpu.memory_space<vmem>>, %arg11: memref<8x128xf32, #tpu.memory_space<vmem>>) attributes {dimension_semantics = [#tpu.dimension_semantics<parallel>], iteration_bounds = array<i64: 1>, scalar_prefetch = 0 : i64, scratch_operands = 0 : i64, tpu.core_type = #tpu.core_type<tc>, window_params = [{transform_indices = @transform_0, window_bounds = array<i64: 8, 64>}, {pipeline_mode = #tpu.pipeline_mode<synchronous>, transform_indices = @transform_1, window_bounds = array<i64: 64, 1024>}, {pipeline_mode = #tpu.pipeline_mode<synchronous>, transform_indices = @transform_2, window_bounds = array<i64: 1024, 512>}, {pipeline_mode = #tpu.pipeline_mode<synchronous>, transform_indices = @transform_3, window_bounds = array<i64: 512, 256>}, {pipeline_mode = #tpu.pipeline_mode<synchronous>, transform_indices = @transform_4, window_bounds = array<i64: 256, 128>}, {pipeline_mode = #tpu.pipeline_mode<synchronous>, transform_indices = @transform_5, window_bounds = array<i64: 128, 64>}, {pipeline_mode = #tpu.pipeline_mode<synchronous>, transform_indices = @transform_6, window_bounds = array<i64: 64, 32>}, {pipeline_mode = #tpu.pipeline_mode<synchronous>, transform_indices = @transform_7, window_bounds = array<i64: 32, 8>}, {pipeline_mode = #tpu.pipeline_mode<synchronous>, transform_indices = @transform_8, window_bounds = array<i64: 8, 128>}, {pipeline_mode = #tpu.pipeline_mode<synchronous>, transform_indices = @transform_9, window_bounds = array<i64: 1, 2432>}, {transform_indices = @transform_10, window_bounds = array<i64: 8, 128>}]} {
    %c0 = arith.constant 0 : index
    %c0_0 = arith.constant 0 : index
    %0 = vector.load %arg1[%c0, %c0_0] : memref<8x64xbf16, #tpu.memory_space<vmem>>, vector<8x64xbf16>
    %c0_1 = arith.constant 0 : index
    %c0_2 = arith.constant 0 : index
    %1 = vector.load %arg10[%c0_1, %c0_2] : memref<1x2432xf32, #tpu.memory_space<vmem>>, vector<1x1024xf32>
    %c0_3 = arith.constant 0 : index
    %c0_4 = arith.constant 0 : index
    %2 = vector.load %arg2[%c0_3, %c0_4] : memref<64x1024xbf16, #tpu.memory_space<vmem>>, vector<64x1024xbf16>
    %cst = arith.constant dense<0.000000e+00> : vector<8x1024xf32>
    %3 = tpu.matmul %0, %2, %cst {dimension_numbers = #tpu.dot_dimension_numbers<[1], [0], [0], [1], [0, 0, 1, 1], [], []>} : vector<8x64xbf16>, vector<64x1024xbf16>, vector<8x1024xf32> -> vector<8x1024xf32>
    %4 = vector.broadcast %1 : vector<1x1024xf32> to vector<8x1024xf32>
    %5 = arith.addf %3, %4 : vector<8x1024xf32>
    %cst_5 = arith.constant 0.000000e+00 : f32
    %6 = vector.broadcast %cst_5 : f32 to vector<8x1024xf32>
    %7 = arith.cmpf oge, %5, %6 : vector<8x1024xf32>
    %cst_6 = arith.constant 0.00999999977 : f32
    %8 = vector.broadcast %cst_6 : f32 to vector<8x1024xf32>
    %9 = arith.mulf %8, %5 : vector<8x1024xf32>
    %10 = arith.select %7, %5, %9 : vector<8x1024xi1>, vector<8x1024xf32>
    %11 = arith.truncf %10 : vector<8x1024xf32> to vector<8x1024xbf16>
    %c0_7 = arith.constant 0 : index
    %c1024 = arith.constant 1024 : index
    %12 = vector.load %arg10[%c0_7, %c1024] : memref<1x2432xf32, #tpu.memory_space<vmem>>, vector<1x512xf32>
    %c0_8 = arith.constant 0 : index
    %c0_9 = arith.constant 0 : index
    %13 = vector.load %arg3[%c0_8, %c0_9] : memref<1024x512xbf16, #tpu.memory_space<vmem>>, vector<1024x512xbf16>
    %cst_10 = arith.constant dense<0.000000e+00> : vector<8x512xf32>
    %14 = tpu.matmul %11, %13, %cst_10 {dimension_numbers = #tpu.dot_dimension_numbers<[1], [0], [0], [1], [0, 0, 1, 1], [], []>} : vector<8x1024xbf16>, vector<1024x512xbf16>, vector<8x512xf32> -> vector<8x512xf32>
    %15 = vector.broadcast %12 : vector<1x512xf32> to vector<8x512xf32>
    %16 = arith.addf %14, %15 : vector<8x512xf32>
    %cst_11 = arith.constant 0.000000e+00 : f32
    %17 = vector.broadcast %cst_11 : f32 to vector<8x512xf32>
    %18 = arith.cmpf oge, %16, %17 : vector<8x512xf32>
    %cst_12 = arith.constant 0.00999999977 : f32
    %19 = vector.broadcast %cst_12 : f32 to vector<8x512xf32>
    %20 = arith.mulf %19, %16 : vector<8x512xf32>
    %21 = arith.select %18, %16, %20 : vector<8x512xi1>, vector<8x512xf32>
    %22 = arith.truncf %21 : vector<8x512xf32> to vector<8x512xbf16>
    %c0_13 = arith.constant 0 : index
    %c1536 = arith.constant 1536 : index
    %23 = vector.load %arg10[%c0_13, %c1536] : memref<1x2432xf32, #tpu.memory_space<vmem>>, vector<1x256xf32>
    %c0_14 = arith.constant 0 : index
    %c0_15 = arith.constant 0 : index
    %24 = vector.load %arg4[%c0_14, %c0_15] : memref<512x256xbf16, #tpu.memory_space<vmem>>, vector<512x256xbf16>
    %cst_16 = arith.constant dense<0.000000e+00> : vector<8x256xf32>
    %25 = tpu.matmul %22, %24, %cst_16 {dimension_numbers = #tpu.dot_dimension_numbers<[1], [0], [0], [1], [0, 0, 1, 1], [], []>} : vector<8x512xbf16>, vector<512x256xbf16>, vector<8x256xf32> -> vector<8x256xf32>
    %26 = vector.broadcast %23 : vector<1x256xf32> to vector<8x256xf32>
    %27 = arith.addf %25, %26 : vector<8x256xf32>
    %cst_17 = arith.constant 0.000000e+00 : f32
    %28 = vector.broadcast %cst_17 : f32 to vector<8x256xf32>
    %29 = arith.cmpf oge, %27, %28 : vector<8x256xf32>
    %cst_18 = arith.constant 0.00999999977 : f32
    %30 = vector.broadcast %cst_18 : f32 to vector<8x256xf32>
    %31 = arith.mulf %30, %27 : vector<8x256xf32>
    %32 = arith.select %29, %27, %31 : vector<8x256xi1>, vector<8x256xf32>
    %33 = arith.truncf %32 : vector<8x256xf32> to vector<8x256xbf16>
    %c0_19 = arith.constant 0 : index
    %c1792 = arith.constant 1792 : index
    %34 = vector.load %arg10[%c0_19, %c1792] : memref<1x2432xf32, #tpu.memory_space<vmem>>, vector<1x128xf32>
    %c0_20 = arith.constant 0 : index
    %c0_21 = arith.constant 0 : index
    %35 = vector.load %arg5[%c0_20, %c0_21] : memref<256x128xbf16, #tpu.memory_space<vmem>>, vector<256x128xbf16>
    %cst_22 = arith.constant dense<0.000000e+00> : vector<8x128xf32>
    %36 = tpu.matmul %33, %35, %cst_22 {dimension_numbers = #tpu.dot_dimension_numbers<[1], [0], [0], [1], [0, 0, 1, 1], [], []>} : vector<8x256xbf16>, vector<256x128xbf16>, vector<8x128xf32> -> vector<8x128xf32>
    %37 = vector.broadcast %34 : vector<1x128xf32> to vector<8x128xf32>
    %38 = arith.addf %36, %37 : vector<8x128xf32>
    %cst_23 = arith.constant 0.000000e+00 : f32
    %39 = vector.broadcast %cst_23 : f32 to vector<8x128xf32>
    %40 = arith.cmpf oge, %38, %39 : vector<8x128xf32>
    %cst_24 = arith.constant 0.00999999977 : f32
    %41 = vector.broadcast %cst_24 : f32 to vector<8x128xf32>
    %42 = arith.mulf %41, %38 : vector<8x128xf32>
    %43 = arith.select %40, %38, %42 : vector<8x128xi1>, vector<8x128xf32>
    %44 = arith.truncf %43 : vector<8x128xf32> to vector<8x128xbf16>
    %c0_25 = arith.constant 0 : index
    %c1920 = arith.constant 1920 : index
    %45 = vector.load %arg10[%c0_25, %c1920] : memref<1x2432xf32, #tpu.memory_space<vmem>>, vector<1x64xf32>
    %c0_26 = arith.constant 0 : index
    %c0_27 = arith.constant 0 : index
    %46 = vector.load %arg6[%c0_26, %c0_27] : memref<128x64xbf16, #tpu.memory_space<vmem>>, vector<128x64xbf16>
    %cst_28 = arith.constant dense<0.000000e+00> : vector<8x64xf32>
    %47 = tpu.matmul %44, %46, %cst_28 {dimension_numbers = #tpu.dot_dimension_numbers<[1], [0], [0], [1], [0, 0, 1, 1], [], []>} : vector<8x128xbf16>, vector<128x64xbf16>, vector<8x64xf32> -> vector<8x64xf32>
    %48 = vector.broadcast %45 : vector<1x64xf32> to vector<8x64xf32>
    %49 = arith.addf %47, %48 : vector<8x64xf32>
    %cst_29 = arith.constant 0.000000e+00 : f32
    %50 = vector.broadcast %cst_29 : f32 to vector<8x64xf32>
    %51 = arith.cmpf oge, %49, %50 : vector<8x64xf32>
    %cst_30 = arith.constant 0.00999999977 : f32
    %52 = vector.broadcast %cst_30 : f32 to vector<8x64xf32>
    %53 = arith.mulf %52, %49 : vector<8x64xf32>
    %54 = arith.select %51, %49, %53 : vector<8x64xi1>, vector<8x64xf32>
    %55 = arith.truncf %54 : vector<8x64xf32> to vector<8x64xbf16>
    %c0_31 = arith.constant 0 : index
    %c2048 = arith.constant 2048 : index
    %56 = vector.load %arg10[%c0_31, %c2048] : memref<1x2432xf32, #tpu.memory_space<vmem>>, vector<1x32xf32>
    %c0_32 = arith.constant 0 : index
    %c0_33 = arith.constant 0 : index
    %57 = vector.load %arg7[%c0_32, %c0_33] : memref<64x32xbf16, #tpu.memory_space<vmem>>, vector<64x32xbf16>
    %cst_34 = arith.constant dense<0.000000e+00> : vector<8x32xf32>
    %58 = tpu.matmul %55, %57, %cst_34 {dimension_numbers = #tpu.dot_dimension_numbers<[1], [0], [0], [1], [0, 0, 1, 1], [], []>} : vector<8x64xbf16>, vector<64x32xbf16>, vector<8x32xf32> -> vector<8x32xf32>
    %59 = vector.broadcast %56 : vector<1x32xf32> to vector<8x32xf32>
    %60 = arith.addf %58, %59 : vector<8x32xf32>
    %cst_35 = arith.constant 0.000000e+00 : f32
    %61 = vector.broadcast %cst_35 : f32 to vector<8x32xf32>
    %62 = arith.cmpf oge, %60, %61 : vector<8x32xf32>
    %cst_36 = arith.constant 0.00999999977 : f32
    %63 = vector.broadcast %cst_36 : f32 to vector<8x32xf32>
    %64 = arith.mulf %63, %60 : vector<8x32xf32>
    %65 = arith.select %62, %60, %64 : vector<8x32xi1>, vector<8x32xf32>
    %66 = arith.truncf %65 : vector<8x32xf32> to vector<8x32xbf16>
    %c0_37 = arith.constant 0 : index
    %c2176 = arith.constant 2176 : index
    %67 = vector.load %arg10[%c0_37, %c2176] : memref<1x2432xf32, #tpu.memory_space<vmem>>, vector<1x8xf32>
    %c0_38 = arith.constant 0 : index
    %c0_39 = arith.constant 0 : index
    %68 = vector.load %arg8[%c0_38, %c0_39] : memref<32x8xbf16, #tpu.memory_space<vmem>>, vector<32x8xbf16>
    %cst_40 = arith.constant dense<0.000000e+00> : vector<8x8xf32>
    %69 = tpu.matmul %66, %68, %cst_40 {dimension_numbers = #tpu.dot_dimension_numbers<[1], [0], [0], [1], [0, 0, 1, 1], [], []>} : vector<8x32xbf16>, vector<32x8xbf16>, vector<8x8xf32> -> vector<8x8xf32>
    %70 = vector.broadcast %67 : vector<1x8xf32> to vector<8x8xf32>
    %71 = arith.addf %69, %70 : vector<8x8xf32>
    %cst_41 = arith.constant 0.000000e+00 : f32
    %72 = vector.broadcast %cst_41 : f32 to vector<8x8xf32>
    %73 = arith.cmpf oge, %71, %72 : vector<8x8xf32>
    %cst_42 = arith.constant 0.00999999977 : f32
    %74 = vector.broadcast %cst_42 : f32 to vector<8x8xf32>
    %75 = arith.mulf %74, %71 : vector<8x8xf32>
    %76 = arith.select %73, %71, %75 : vector<8x8xi1>, vector<8x8xf32>
    %77 = arith.truncf %76 : vector<8x8xf32> to vector<8x8xbf16>
    %c0_43 = arith.constant 0 : index
    %c2304 = arith.constant 2304 : index
    %78 = vector.load %arg10[%c0_43, %c2304] : memref<1x2432xf32, #tpu.memory_space<vmem>>, vector<1x128xf32>
    %c0_44 = arith.constant 0 : index
    %c0_45 = arith.constant 0 : index
    %79 = vector.load %arg9[%c0_44, %c0_45] : memref<8x128xbf16, #tpu.memory_space<vmem>>, vector<8x128xbf16>
    %cst_46 = arith.constant dense<0.000000e+00> : vector<8x128xf32>
    %80 = tpu.matmul %77, %79, %cst_46 {dimension_numbers = #tpu.dot_dimension_numbers<[1], [0], [0], [1], [0, 0, 1, 1], [], []>} : vector<8x8xbf16>, vector<8x128xbf16>, vector<8x128xf32> -> vector<8x128xf32>
    %81 = vector.broadcast %78 : vector<1x128xf32> to vector<8x128xf32>
    %82 = arith.addf %80, %81 : vector<8x128xf32>
    %c0_47 = arith.constant 0 : index
    %c0_48 = arith.constant 0 : index
    %83 = vector.load %arg11[%c0_47, %c0_48] : memref<8x128xf32, #tpu.memory_space<vmem>>, vector<8x128xf32>
    tpu.vector_store %arg11[%c0_47, %c0_48], %82 {strides = array<i32>} : memref<8x128xf32, #tpu.memory_space<vmem>>, vector<8x128xf32>,
    return
  }
  func.func @transform_0(%arg0: i32) -> (i32, i32) {
    %c0_i32 = arith.constant 0 : i32
    %c0_i32_0 = arith.constant 0 : i32
    return %arg0, %c0_i32 : i32, i32
  }
  func.func @transform_1(%arg0: i32) -> (i32, i32) {
    %c0_i32 = arith.constant 0 : i32
    %c0_i32_0 = arith.constant 0 : i32
    %c0_i32_1 = arith.constant 0 : i32
    return %c0_i32, %c0_i32_0 : i32, i32
  }
  func.func @transform_2(%arg0: i32) -> (i32, i32) {
    %c0_i32 = arith.constant 0 : i32
    %c0_i32_0 = arith.constant 0 : i32
    %c0_i32_1 = arith.constant 0 : i32
    return %c0_i32, %c0_i32_0 : i32, i32
  }
  func.func @transform_3(%arg0: i32) -> (i32, i32) {
    %c0_i32 = arith.constant 0 : i32
    %c0_i32_0 = arith.constant 0 : i32
    %c0_i32_1 = arith.constant 0 : i32
    return %c0_i32, %c0_i32_0 : i32, i32
  }
  func.func @transform_4(%arg0: i32) -> (i32, i32) {
    %c0_i32 = arith.constant 0 : i32
    %c0_i32_0 = arith.constant 0 : i32
    %c0_i32_1 = arith.constant 0 : i32
    return %c0_i32, %c0_i32_0 : i32, i32
  }
  func.func @transform_5(%arg0: i32) -> (i32, i32) {
    %c0_i32 = arith.constant 0 : i32
    %c0_i32_0 = arith.constant 0 : i32
    %c0_i32_1 = arith.constant 0 : i32
    return %c0_i32, %c0_i32_0 : i32, i32
  }
  func.func @transform_6(%arg0: i32) -> (i32, i32) {
    %c0_i32 = arith.constant 0 : i32
    %c0_i32_0 = arith.constant 0 : i32
    %c0_i32_1 = arith.constant 0 : i32
    return %c0_i32, %c0_i32_0 : i32, i32
  }
  func.func @transform_7(%arg0: i32) -> (i32, i32) {
    %c0_i32 = arith.constant 0 : i32
    %c0_i32_0 = arith.constant 0 : i32
    %c0_i32_1 = arith.constant 0 : i32
    return %c0_i32, %c0_i32_0 : i32, i32
  }
  func.func @transform_8(%arg0: i32) -> (i32, i32) {
    %c0_i32 = arith.constant 0 : i32
    %c0_i32_0 = arith.constant 0 : i32
    %c0_i32_1 = arith.constant 0 : i32
    return %c0_i32, %c0_i32_0 : i32, i32
  }
  func.func @transform_9(%arg0: i32) -> (i32, i32) {
    %c0_i32 = arith.constant 0 : i32
    %c0_i32_0 = arith.constant 0 : i32
    %c0_i32_1 = arith.constant 0 : i32
    return %c0_i32, %c0_i32_0 : i32, i32
  }
  func.func @transform_10(%arg0: i32) -> (i32, i32) {
    %c0_i32 = arith.constant 0 : i32
    %c0_i32_0 = arith.constant 0 : i32
    return %arg0, %c0_i32 : i32, i32
  }
}

</mosaic_0001>

<bundles_post_ra>
// kernel: crop_mlp_forward.1
= control target key start
LH: loop header
LB: loop body
LE: loop exit
PB: predicated region body
PF: predicated region fallthrough
CT: control target
= control target key end

     0   :  { %15 = vsyncpa [#allocation3], 0  ;;  %s4806_s0 = inlined_call_operand.vmem [shape: bf16[8,64], index: 0, kind: input, shape index: {}]   ;;  %s4807_s1 = inlined_call_operand.hbm [shape: bf16[64,1024], index: 1, kind: input, shape index: {}]   ;;  %s4808_s2 = inlined_call_operand.hbm [shape: bf16[1024,512], index: 2, kind: input, shape index: {}]   ;;  %s4809_s3 = inlined_call_operand.hbm [shape: bf16[512,256], index: 3, kind: input, shape index: {}]   ;;  %s4810_s4 = inlined_call_operand.vmem [shape: bf16[256,128], index: 4, kind: input, shape index: {}]   ;;  %s4811_s5 = inlined_call_operand.vmem [shape: bf16[128,64], index: 5, kind: input, shape index: {}]   ;;  %s4812_s6 = inlined_call_operand.vmem [shape: bf16[64,32], index: 6, kind: input, shape index: {}]   ;;  %s4813_s7 = inlined_call_operand.vmem [shape: bf16[32,8], index: 7, kind: input, shape index: {}]   ;;  %s4814_s8 = inlined_call_operand.vmem [shape: bf16[8,128], index: 8, kind: input, shape index: {}]   ;;  %s4815_s9 = inlined_call_operand.vmem [shape: f32[1,2432], index: 9, kind: input, shape index: {}]   ;;  %s4816_s10 = inlined_call_operand.vmem [shape: f32[8,128], index: 10, kind: output, shape index: {}]  }
   0x1   :  { %16 = vsyncpa [#allocation5], 0  ;;  %s4481_s13 = smov [#allocation4]  }
   0x2   :  { %s36_s14 = sshll.u32 %s4481_s13, 4  ;;  %s37_s14 = int_to_ptr.vmem [resolvable:$true] %s36_s14 }
   0x3   :  { %s4425_s15 = scalar_lea.vmem %s37_s14, 32768  ;;  %p4430_p1 = scmp.lt.s32.totalorder %s37_s14, %s37_s14 }
   0x4   :  { %p4426_p0 = scmp.ne.s32.totalorder %s37_s14, %s4425_s15  ;;  %p4431_p2 = scmp.lt.s32.totalorder %s4425_s15, %s4425_s15 }
   0x6   :  { %p4432_p3 = por %p4431_p2, %p4430_p1 }
   0x8   :  { %p4433_p4 = pnand %p4432_p3, %p4426_p0 }
   0xa   :  { %4436 = shalt.err (!%p4433_p4)
}
   0xb   :  { %s4482_s16 = smov 256   ;;  %s4483_s17 = smov 16  }
   0xc   :  { %42 = dma.hbm_to_vmem [thread:$0]  %s4808_s2, 32768, %s37_s14, [#allocation5], %s4482_s16, %s4482_s16, %s4483_s17  }
   0xd   :  { %s4484_s20 = smov [#allocation2]  }
   0xe   :  { %s24_s21 = sshll.u32 %s4484_s20, 4  ;;  %s25_s21 = int_to_ptr.vmem [resolvable:$true] %s24_s21 }
   0xf   :  { %s4445_s22 = scalar_lea.vmem %s25_s21, 4096  ;;  %p4450_p6 = scmp.lt.s32.totalorder %s25_s21, %s25_s21 }
  0x10   :  { %p4446_p5 = scmp.ne.s32.totalorder %s25_s21, %s4445_s22  ;;  %p4451_p7 = scmp.lt.s32.totalorder %s4445_s22, %s4445_s22 }
  0x12   :  { %p4452_p8 = por %p4451_p7, %p4450_p6 }
  0x14   :  { %p4453_p9 = pnand %p4452_p8, %p4446_p5 }
  0x16   :  { %4456 = shalt.err (!%p4453_p9)
}
  0x17   :  { %s4485_s23 = smov 512   ;;  %s4486_s24 = smov 32  }
  0x18   :  { %30 = dma.hbm_to_vmem [thread:$0]  %s4807_s1, 4096, %s25_s21, [#allocation3], %s4485_s23, %s4485_s23, %s4486_s24  }
  0x19   :  { %s4487_s27 = smov [#allocation6]  }
  0x1a   :  { %s48_s28 = sshll.u32 %s4487_s27, 4  ;;  %s49_s28 = int_to_ptr.vmem [resolvable:$true] %s48_s28 }
  0x1b   :  { %s4465_s2 = scalar_lea.vmem %s49_s28, 8192  ;;  %p4470_p11 = scmp.lt.s32.totalorder %s49_s28, %s49_s28 }
  0x1c   :  { %p4466_p10 = scmp.ne.s32.totalorder %s49_s28, %s4465_s2  ;;  %p4471_p12 = scmp.lt.s32.totalorder %s4465_s2, %s4465_s2 }
  0x1e   :  { %p4472_p13 = por %p4471_p12, %p4470_p11 }
  0x20   :  { %p4473_p0 = pnand %p4472_p13, %p4466_p10 }
  0x22   :  { %4476 = shalt.err (!%p4473_p0)
}
  0x23   :  { %s4488_s29 = smov 128   ;;  %s4489_s30 = smov 8  }
  0x24   :  { %54 = dma.hbm_to_vmem [thread:$0]  %s4809_s3, 8192, %s49_s28, [#allocation5], %s4488_s29, %s4488_s29, %s4489_s30  }
  0x25   :  { %4477 = dma.done.wait [#allocation3], 4096  }
  0x26   :  { %4478 = vsyncadd [#allocation3], 4294963200 }
  0x27   :  { %4479 = dma.done.wait [#allocation5], 40960  }
  0x28   :  { %4480 = vsyncadd [#allocation5], 4294926336  ;;  %v4490_v0 = vmov 0   ;;  %v103_v1 = vld [vmem:[#allocation2 + $0xc0] sm:$0xff]  ;;  %v104_v3 = vld [vmem:[#allocation2 + $0xc8] sm:$0xff]  ;;  %vm312_vm0 = vcmask 523264  }
  0x29   :  { %348 = vmatprep.mubr.bf16.mxu0 %v4490_v0  ;;  %389 = vmatprep.mubr.bf16.mxu1 %v4490_v0  ;;  %v107_v2 = vld [vmem:[#allocation2 + $0xe0] sm:$0xff]  ;;  %v108_v5 = vld [vmem:[#allocation2 + $0xe8] sm:$0xff]  ;;  %v105_v31 = vld [vmem:[#allocation2 + $0xd0] sm:$0xff]  ;;  %vm4492_vm15 = vmmov 0  }
  0x2a   :  { %v3439_v4 = vcombine.high %v103_v1, %v107_v2  ;;  %v3438_v6 = vcombine.low %v103_v1, %v107_v2  ;;  %v95_v7 = vld [vmem:[#allocation2 + $0x80] sm:$0xff]  ;;  %v3441_v9 = vcombine.high %v104_v3, %v108_v5  ;;  %v3440_v10 = vcombine.low %v104_v3, %v108_v5  ;;  %v96_v12 = vld [vmem:[#allocation2 + $0x88] sm:$0xff]  ;;  %v109_v32 = vld [vmem:[#allocation2 + $0xf0] sm:$0xff] }
  0x2b   :  { %v99_v8 = vld [vmem:[#allocation2 + $0xa0] sm:$0xff]  ;;  %v100_v13 = vld [vmem:[#allocation2 + $0xa8] sm:$0xff]  ;;  %v106_v33 = vld [vmem:[#allocation2 + $0xd8] sm:$0xff]  ;;  %v3443_v37 = vcombine.high %v105_v31, %v109_v32  ;;  %v3442_v44 = vcombine.low %v105_v31, %v109_v32 }
  0x2c   :  { %v3431_v11 = vcombine.high %v95_v7, %v99_v8  ;;  %v87_v14 = vld [vmem:[#allocation2 + $0x40] sm:$0xff]  ;;  %324 = vmatprep.subr.bf16.mxu0 %v3439_v4  ;;  %v3433_v15 = vcombine.high %v96_v12, %v100_v13  ;;  %v88_v17 = vld [vmem:[#allocation2 + $0x48] sm:$0xff]  ;;  %365 = vmatprep.subr.bf16.mxu1 %v3441_v9  ;;  %v3430_v19 = vcombine.low %v95_v7, %v99_v8  ;;  %v110_v34 = vld [vmem:[#allocation2 + $0xf8] sm:$0xff] }
  0x2d   :  { %v91_v16 = vld [vmem:[#allocation2 + $0x60] sm:$0xff]  ;;  %v92_v18 = vld [vmem:[#allocation2 + $0x68] sm:$0xff]  ;;  %325 = vmatpush1.bf16.msra.mxu0 %v3438_v6  ;;  %366 = vmatpush1.bf16.msra.mxu1 %v3440_v10  ;;  %v3432_v20 = vcombine.low %v96_v12, %v100_v13  ;;  %v97_v38 = vld [vmem:[#allocation2 + $0x90] sm:$0xff]  ;;  %v3445_v39 = vcombine.high %v106_v33, %v110_v34  ;;  %v3444_v45 = vcombine.low %v106_v33, %v110_v34 }
  0x2e   :  { %326 = vmatprep.subr.bf16.mxu0 %v3431_v11  ;;  %v3423_v21 = vcombine.high %v87_v14, %v91_v16  ;;  %367 = vmatprep.subr.bf16.mxu1 %v3433_v15  ;;  %v3425_v22 = vcombine.high %v88_v17, %v92_v18  ;;  %v79_v23 = vld [vmem:[#allocation2] sm:$0xff]  ;;  %v80_v25 = vld [vmem:[#allocation2 + $0x8] sm:$0xff]  ;;  %v3422_v27 = vcombine.low %v87_v14, %v91_v16  ;;  %v101_v40 = vld [vmem:[#allocation2 + $0xb0] sm:$0xff] }
  0x2f   :  { %v83_v24 = vld [vmem:[#allocation2 + $0x20] sm:$0xff]  ;;  %v84_v26 = vld [vmem:[#allocation2 + $0x28] sm:$0xff]  ;;  %v3424_v28 = vcombine.low %v88_v17, %v92_v18  ;;  %v98_v41 = vld [vmem:[#allocation2 + $0x98] sm:$0xff]  ;;  %v3435_v46 = vcombine.high %v97_v38, %v101_v40  ;;  %v3434_v52 = vcombine.low %v97_v38, %v101_v40 }
  0x30   :  { %v3415_v29 = vcombine.high %v79_v23, %v83_v24  ;;  %v3417_v30 = vcombine.high %v80_v25, %v84_v26  ;;  %v3414_v35 = vcombine.low %v79_v23, %v83_v24  ;;  %v3416_v36 = vcombine.low %v80_v25, %v84_v26  ;;  %v102_v42 = vld [vmem:[#allocation2 + $0xb8] sm:$0xff]  ;;  %v77_v43 = vld [vmem:[%s4806_s0] sm:$0xf]  ;;  %v89_v47 = vld [vmem:[#allocation2 + $0x50] sm:$0xff] }
  0x31   :  { %327 = vmatpush1.bf16.msra.mxu0 %v3430_v19  ;;  %368 = vmatpush1.bf16.msra.mxu1 %v3432_v20  ;;  %v3437_v48 = vcombine.high %v98_v41, %v102_v42  ;;  %v93_v49 = vld [vmem:[#allocation2 + $0x70] sm:$0xff]  ;;  %v90_v50 = vld [vmem:[#allocation2 + $0x58] sm:$0xff]  ;;  %v3436_v53 = vcombine.low %v98_v41, %v102_v42 }
  0x32   :  { %328 = vmatprep.subr.bf16.mxu0 %v3423_v21  ;;  %369 = vmatprep.subr.bf16.mxu1 %v3425_v22  ;;  %v94_v51 = vld [vmem:[#allocation2 + $0x78] sm:$0xff]  ;;  %v3427_v54 = vcombine.high %v89_v47, %v93_v49  ;;  %v81_v55 = vld [vmem:[#allocation2 + $0x10] sm:$0xff]  ;;  %v3426_v60 = vcombine.low %v89_v47, %v93_v49 }
  0x33   :  { %v3429_v56 = vcombine.high %v90_v50, %v94_v51  ;;  %v85_v57 = vld [vmem:[#allocation2 + $0x30] sm:$0xff]  ;;  %v82_v58 = vld [vmem:[#allocation2 + $0x18] sm:$0xff]  ;;  %v3428_v61 = vcombine.low %v90_v50, %v94_v51 }
  0x34   :  { %v86_v59 = vld [vmem:[#allocation2 + $0x38] sm:$0xff]  ;;  %v3419_v62 = vcombine.high %v81_v55, %v85_v57  ;;  %v3418_v1 = vcombine.low %v81_v55, %v85_v57  ;;  %v3909_v3 = vld [vmem:[#allocation4 + $0xe4] ss:$16 sps:$4 sm:$0xff]   ;;  %v3907_v5 = vld [vmem:[#allocation4 + $0xe0] ss:$16 sps:$4 sm:$0xff]  }
  0x35   :  { %329 = vmatpush1.bf16.msra.mxu0 %v3422_v27  ;;  %370 = vmatpush1.bf16.msra.mxu1 %v3424_v28  ;;  %v3421_v63 = vcombine.high %v82_v58, %v86_v59  ;;  %v3420_v2 = vcombine.low %v82_v58, %v86_v59  ;;  %v3912_v4 = vld [vmem:[#allocation4 + $0x2e4] ss:$16 sps:$4 sm:$0xff]   ;;  %v3913_v8 = vld [vmem:[#allocation4 + $0xc0] ss:$16 sps:$4 sm:$0xff]  }
  0x36   :  { %330 = vmatprep.subr.bf16.mxu0 %v3415_v29  ;;  %371 = vmatprep.subr.bf16.mxu1 %v3417_v30  ;;  %v3915_v6 = vld [vmem:[#allocation4 + $0xc4] ss:$16 sps:$4 sm:$0xff]   ;;  %v3916_v9 = vld [vmem:[#allocation4 + $0x2c0] ss:$16 sps:$4 sm:$0xff]  }
  0x37   :  { %v3918_v7 = vld [vmem:[#allocation4 + $0x2c4] ss:$16 sps:$4 sm:$0xff]   ;;  %v3919_v12 = vld [vmem:[#allocation4 + $0xa0] ss:$16 sps:$4 sm:$0xff]  }
  0x38   :  { %v3921_v10 = vld [vmem:[#allocation4 + $0xa4] ss:$16 sps:$4 sm:$0xff]   ;;  %v3922_v13 = vld [vmem:[#allocation4 + $0x2a0] ss:$16 sps:$4 sm:$0xff]  }
  0x39   :  { %331 = vmatpush1.bf16.msra.mxu0 %v3414_v35  ;;  %372 = vmatpush1.bf16.msra.mxu1 %v3416_v36  ;;  %v3924_v11 = vld [vmem:[#allocation4 + $0x2a4] ss:$16 sps:$4 sm:$0xff]   ;;  %v3925_v16 = vld [vmem:[#allocation4 + $0x80] ss:$16 sps:$4 sm:$0xff]  }
  0x3a   :  { %406 = vmatprep.subr.bf16.mxu0 %v3443_v37  ;;  %447 = vmatprep.subr.bf16.mxu1 %v3445_v39  ;;  %v3927_v14 = vld [vmem:[#allocation4 + $0x84] ss:$16 sps:$4 sm:$0xff]   ;;  %v3928_v17 = vld [vmem:[#allocation4 + $0x280] ss:$16 sps:$4 sm:$0xff]  }
  0x3b   :  { %v3930_v15 = vld [vmem:[#allocation4 + $0x284] ss:$16 sps:$4 sm:$0xff]   ;;  %v3931_v19 = vld [vmem:[#allocation4 + $0x60] ss:$16 sps:$4 sm:$0xff]  }
  0x3c   :  { %3446 = vmatmul.mubr.msk.bf16.vlgmr.msra.gmra.mxu0 %vm312_vm0, %v77_v43  ;;  %3447 = vmatmul.mubr.msk.bf16.vlgmr.msra.gmra.mxu1 %vm312_vm0, %v77_v43  ;;  %v3933_v18 = vld [vmem:[#allocation4 + $0x64] ss:$16 sps:$4 sm:$0xff]   ;;  %v3934_v21 = vld [vmem:[#allocation4 + $0x260] ss:$16 sps:$4 sm:$0xff]  }
  0x3d   :  { %407 = vmatpush1.bf16.msra.mxu0 %v3442_v44  ;;  %448 = vmatpush1.bf16.msra.mxu1 %v3444_v45  ;;  %v3936_v20 = vld [vmem:[#allocation4 + $0x264] ss:$16 sps:$4 sm:$0xff]   ;;  %v3937_v24 = vld [vmem:[#allocation4 + $0x40] ss:$16 sps:$4 sm:$0xff]  }
  0x3e   :  { %408 = vmatprep.subr.bf16.mxu0 %v3435_v46  ;;  %449 = vmatprep.subr.bf16.mxu1 %v3437_v48  ;;  %v3939_v22 = vld [vmem:[#allocation4 + $0x44] ss:$16 sps:$4 sm:$0xff]   ;;  %v3940_v25 = vld [vmem:[#allocation4 + $0x240] ss:$16 sps:$4 sm:$0xff]  }
  0x3f   :  { %430 = vmatprep.mubr.bf16.mxu0 %v4490_v0  ;;  %471 = vmatprep.mubr.bf16.mxu1 %v4490_v0  ;;  %v3910_v0 = vld [vmem:[#allocation4 + $0x2e0] ss:$16 sps:$4 sm:$0xff]   ;;  %v3942_v23 = vld [vmem:[#allocation4 + $0x244] ss:$16 sps:$4 sm:$0xff]  }
  0x40   :  { %v3945_v26 = vld [vmem:[#allocation4 + $0x24] ss:$16 sps:$4 sm:$0xff]   ;;  %v3943_v28 = vld [vmem:[#allocation4 + $0x20] ss:$16 sps:$4 sm:$0xff]  }
  0x41   :  { %409 = vmatpush1.bf16.msra.mxu0 %v3434_v52  ;;  %450 = vmatpush1.bf16.msra.mxu1 %v3436_v53  ;;  %v3948_v27 = vld [vmem:[#allocation4 + $0x224] ss:$16 sps:$4 sm:$0xff]   ;;  %v3946_v29 = vld [vmem:[#allocation4 + $0x220] ss:$16 sps:$4 sm:$0xff]  }
  0x42   :  { %410 = vmatprep.subr.bf16.mxu0 %v3427_v54  ;;  %451 = vmatprep.subr.bf16.mxu1 %v3429_v56  ;;  %v3951_v30 = vld [vmem:[#allocation4 + $0x4] ss:$16 sps:$4 sm:$0xff]   ;;  %v3949_v32 = vld [vmem:[#allocation4] ss:$16 sps:$4 sm:$0xff]  }
  0x43   :  { %v3954_v31 = vld [vmem:[#allocation4 + $0x204] ss:$16 sps:$4 sm:$0xff]   ;;  %v3952_v33 = vld [vmem:[#allocation4 + $0x200] ss:$16 sps:$4 sm:$0xff]  }
  0x44   :  { %v3957_v34 = vld [vmem:[#allocation4 + $0x1e4] ss:$16 sps:$4 sm:$0xff]   ;;  %v3955_v36 = vld [vmem:[#allocation4 + $0x1e0] ss:$16 sps:$4 sm:$0xff]  }
  0x45   :  { %411 = vmatpush1.bf16.msra.mxu0 %v3426_v60  ;;  %452 = vmatpush1.bf16.msra.mxu1 %v3428_v61  ;;  %v3960_v35 = vld [vmem:[#allocation4 + $0x3e4] ss:$16 sps:$4 sm:$0xff]   ;;  %v3958_v37 = vld [vmem:[#allocation4 + $0x3e0] ss:$16 sps:$4 sm:$0xff]  }
  0x46   :  { %412 = vmatprep.subr.bf16.mxu0 %v3419_v62  ;;  %453 = vmatprep.subr.bf16.mxu1 %v3421_v63  ;;  %v3963_v38 = vld [vmem:[#allocation4 + $0x1c4] ss:$16 sps:$4 sm:$0xff]   ;;  %v3961_v40 = vld [vmem:[#allocation4 + $0x1c0] ss:$16 sps:$4 sm:$0xff]  }
  0x47   :  { %v3966_v39 = vld [vmem:[#allocation4 + $0x3c4] ss:$16 sps:$4 sm:$0xff]   ;;  %v3964_v41 = vld [vmem:[#allocation4 + $0x3c0] ss:$16 sps:$4 sm:$0xff]  }
  0x48   :  { %v3969_v42 = vld [vmem:[#allocation4 + $0x1a4] ss:$16 sps:$4 sm:$0xff]   ;;  %v3967_v44 = vld [vmem:[#allocation4 + $0x1a0] ss:$16 sps:$4 sm:$0xff]  }
  0x49   :  { %413 = vmatpush1.bf16.msra.mxu0 %v3418_v1  ;;  %454 = vmatpush1.bf16.msra.mxu1 %v3420_v2  ;;  %v3970_v45 = vld [vmem:[#allocation4 + $0x3a0] ss:$16 sps:$4 sm:$0xff]   ;;  %v3975_v46 = vld [vmem:[#allocation4 + $0x184] ss:$16 sps:$4 sm:$0xff]  }
  0x4a   :  { %2070 = vmatprep.subr.bf16.mxu0 %v3909_v3  ;;  %2111 = vmatprep.subr.bf16.mxu1 %v3912_v4  ;;  %v3978_v47 = vld [vmem:[#allocation4 + $0x384] ss:$16 sps:$4 sm:$0xff]   ;;  %v3973_v48 = vld [vmem:[#allocation4 + $0x180] ss:$16 sps:$4 sm:$0xff]  }
  0x4b   :  { %v3976_v49 = vld [vmem:[#allocation4 + $0x380] ss:$16 sps:$4 sm:$0xff]   ;;  %v3981_v50 = vld [vmem:[#allocation4 + $0x164] ss:$16 sps:$4 sm:$0xff]  }
  0x4c   :  { %3448 = vmatmul.mubr.msk.bf16.vlgmr.msra.gmra.mxu0 %vm312_vm0, %v77_v43  ;;  %3449 = vmatmul.mubr.msk.bf16.vlgmr.msra.gmra.mxu1 %vm312_vm0, %v77_v43  ;;  %v3972_v43 = vld [vmem:[#allocation4 + $0x3a4] ss:$16 sps:$4 sm:$0xff]   ;;  %v3979_v52 = vld [vmem:[#allocation4 + $0x160] ss:$16 sps:$4 sm:$0xff]  }
  0x4d   :  { %2071 = vmatpush1.bf16.msra.mxu0 %v3907_v5  ;;  %2112 = vmatpush1.bf16.msra.mxu1 %v3910_v0  ;;  %v3984_v51 = vld [vmem:[#allocation4 + $0x364] ss:$16 sps:$4 sm:$0xff]   ;;  %v3982_v53 = vld [vmem:[#allocation4 + $0x360] ss:$16 sps:$4 sm:$0xff]   ;;  %v112_v5 = vlaneseq }
  0x4e   :  { %2072 = vmatprep.subr.bf16.mxu0 %v3915_v6  ;;  %2113 = vmatprep.subr.bf16.mxu1 %v3918_v7  ;;  %v3987_v54 = vld [vmem:[#allocation4 + $0x144] ss:$16 sps:$4 sm:$0xff]   ;;  %v3985_v56 = vld [vmem:[#allocation4 + $0x140] ss:$16 sps:$4 sm:$0xff]  }
  0x4f   :  { %v3990_v55 = vld [vmem:[#allocation4 + $0x344] ss:$16 sps:$4 sm:$0xff]   ;;  %v3988_v57 = vld [vmem:[#allocation4 + $0x340] ss:$16 sps:$4 sm:$0xff]   ;;  %v4568_v0 = vshrl.u32 %v112_v5, 7 }
  0x50   :  { %v3993_v58 = vld [vmem:[#allocation4 + $0x124] ss:$16 sps:$4 sm:$0xff]   ;;  %v3991_v60 = vld [vmem:[#allocation4 + $0x120] ss:$16 sps:$4 sm:$0xff]  }
  0x51   :  { %2073 = vmatpush1.bf16.msra.mxu0 %v3913_v8  ;;  %2114 = vmatpush1.bf16.msra.mxu1 %v3916_v9  ;;  %v3996_v59 = vld [vmem:[#allocation4 + $0x324] ss:$16 sps:$4 sm:$0xff]   ;;  %v3994_v61 = vld [vmem:[#allocation4 + $0x320] ss:$16 sps:$4 sm:$0xff]   ;;  %v4571_v6 = vsub.s32 0, %v4568_v0  ;;  %v122_v8 = vsub.s32 2, %v4568_v0 }
  0x52   :  { %2074 = vmatprep.subr.bf16.mxu0 %v3921_v10  ;;  %2115 = vmatprep.subr.bf16.mxu1 %v3924_v11  ;;  %v3999_v62 = vld [vmem:[#allocation4 + $0x104] ss:$16 sps:$4 sm:$0xff]   ;;  %v3997_v1 = vld [vmem:[#allocation4 + $0x100] ss:$16 sps:$4 sm:$0xff]   ;;  %v4580_v9 = vsub.s32 1, %v4568_v0  ;;  %v126_v10 = vsub.s32 3, %v4568_v0 }
  0x53   :  { %v4002_v63 = vld [vmem:[#allocation4 + $0x304] ss:$16 sps:$4 sm:$0xff]   ;;  %v4000_v2 = vld [vmem:[#allocation4 + $0x300] ss:$16 sps:$4 sm:$0xff]  }
  0x54   :  { %v4005_v3 = vld [vmem:[#allocation4 + $0x4e4] ss:$16 sps:$4 sm:$0xff]  }
  0x55   :  { %2075 = vmatpush1.bf16.msra.mxu0 %v3919_v12  ;;  %2116 = vmatpush1.bf16.msra.mxu1 %v3922_v13  ;;  %v4008_v4 = vld [vmem:[#allocation4 + $0x6e4] ss:$16 sps:$4 sm:$0xff]  }
  0x56   :  { %2076 = vmatprep.subr.bf16.mxu0 %v3927_v14  ;;  %2117 = vmatprep.subr.bf16.mxu1 %v3930_v15  ;;  %v4576_v7 = vld [vmem:[%s4815_s9] sm:$0xff] }
  0x57   :  { %v115_v11 = vrot.slane %v4576_v7, %v4571_v6  ;;  %v123_v12 = vrot.slane %v4576_v7, %v122_v8  ;;  %v119_v13 = vrot.slane %v4576_v7, %v4580_v9  ;;  %v127_v15 = vrot.slane %v4576_v7, %v126_v10 }
  0x59   :  { %2077 = vmatpush1.bf16.msra.mxu0 %v3925_v16  ;;  %2118 = vmatpush1.bf16.msra.mxu1 %v3928_v17 }
  0x5a   :  { %2078 = vmatprep.subr.bf16.mxu0 %v3933_v18  ;;  %2119 = vmatprep.subr.bf16.mxu1 %v3936_v20 }
  0x5d   :  { %2079 = vmatpush1.bf16.msra.mxu0 %v3931_v19  ;;  %2120 = vmatpush1.bf16.msra.mxu1 %v3934_v21 }
  0x5e   :  { %2080 = vmatprep.subr.bf16.mxu0 %v3939_v22  ;;  %2121 = vmatprep.subr.bf16.mxu1 %v3942_v23 }
  0x61   :  { %2081 = vmatpush1.bf16.msra.mxu0 %v3937_v24  ;;  %2122 = vmatpush1.bf16.msra.mxu1 %v3940_v25 }
  0x62   :  { %2082 = vmatprep.subr.bf16.mxu0 %v3945_v26  ;;  %2123 = vmatprep.subr.bf16.mxu1 %v3948_v27 }
  0x65   :  { %2083 = vmatpush1.bf16.msra.mxu0 %v3943_v28  ;;  %2124 = vmatpush1.bf16.msra.mxu1 %v3946_v29 }
  0x66   :  { %2084 = vmatprep.subr.bf16.mxu0 %v3951_v30  ;;  %2125 = vmatprep.subr.bf16.mxu1 %v3954_v31 }
  0x69   :  { %2085 = vmatpush1.bf16.msra.mxu0 %v3949_v32  ;;  %2126 = vmatpush1.bf16.msra.mxu1 %v3952_v33 }
  0x6a   :  { %2086 = vmatprep.subr.bf16.mxu0 %v3957_v34  ;;  %2127 = vmatprep.subr.bf16.mxu1 %v3960_v35 }
  0x6d   :  { %2087 = vmatpush2.bf16.msra.mxu0 %v3955_v36  ;;  %2128 = vmatpush2.bf16.msra.mxu1 %v3958_v37  ;;  %v4003_v36 = vld [vmem:[#allocation4 + $0x4e0] ss:$16 sps:$4 sm:$0xff]  }
  0x6e   :  { %2088 = vmatprep.subr.bf16.mxu0 %v3963_v38  ;;  %2129 = vmatprep.subr.bf16.mxu1 %v3966_v39  ;;  %v4006_v39 = vld [vmem:[#allocation4 + $0x6e0] ss:$16 sps:$4 sm:$0xff]  }
  0x71   :  { %2089 = vmatpush2.bf16.msra.mxu0 %v3961_v40  ;;  %2130 = vmatpush2.bf16.msra.mxu1 %v3964_v41  ;;  %v4011_v40 = vld [vmem:[#allocation4 + $0x4c4] ss:$16 sps:$4 sm:$0xff]  }
  0x72   :  { %2090 = vmatprep.subr.bf16.mxu0 %v3969_v42  ;;  %2131 = vmatprep.subr.bf16.mxu1 %v3972_v43  ;;  %v4014_v42 = vld [vmem:[#allocation4 + $0x6c4] ss:$16 sps:$4 sm:$0xff]   ;;  %v134_v43 = vsub.s32 5, %v4568_v0 }
  0x75   :  { %2091 = vmatpush2.bf16.msra.mxu0 %v3967_v44  ;;  %2132 = vmatpush2.bf16.msra.mxu1 %v3970_v45  ;;  %v4009_v44 = vld [vmem:[#allocation4 + $0x4c0] ss:$16 sps:$4 sm:$0xff]   ;;  %v142_v45 = vsub.s32 7, %v4568_v0 }
  0x76   :  { %2092 = vmatprep.subr.bf16.mxu0 %v3975_v46  ;;  %2133 = vmatprep.subr.bf16.mxu1 %v3978_v47  ;;  %v4012_v46 = vld [vmem:[#allocation4 + $0x6c0] ss:$16 sps:$4 sm:$0xff]   ;;  %v4017_v47 = vld [vmem:[#allocation4 + $0x4a4] ss:$16 sps:$4 sm:$0xff]  }
  0x79   :  { %2093 = vmatpush2.bf16.msra.mxu0 %v3973_v48  ;;  %2134 = vmatpush2.bf16.msra.mxu1 %v3976_v49  ;;  %v4020_v48 = vld [vmem:[#allocation4 + $0x6a4] ss:$16 sps:$4 sm:$0xff]   ;;  %v135_v49 = vrot.slane %v4576_v7, %v134_v43 }
  0x7a   :  { %2094 = vmatprep.subr.bf16.mxu0 %v3981_v50  ;;  %2135 = vmatprep.subr.bf16.mxu1 %v3984_v51  ;;  %v4015_v50 = vld [vmem:[#allocation4 + $0x4a0] ss:$16 sps:$4 sm:$0xff]   ;;  %v4065_v43 = vld [vmem:[#allocation4 + $0x5a4] ss:$16 sps:$4 sm:$0xff]  }
  0x7d   :  { %2095 = vmatpush2.bf16.msra.mxu0 %v3979_v52  ;;  %2136 = vmatpush2.bf16.msra.mxu1 %v3982_v53  ;;  %v143_v52 = vrot.slane %v4576_v7, %v142_v45  ;;  %v4018_v53 = vld [vmem:[#allocation4 + $0x6a0] ss:$16 sps:$4 sm:$0xff]  }
  0x7e   :  { %2096 = vmatprep.subr.bf16.mxu0 %v3987_v54  ;;  %2137 = vmatprep.subr.bf16.mxu1 %v3990_v55  ;;  %v4023_v54 = vld [vmem:[#allocation4 + $0x484] ss:$16 sps:$4 sm:$0xff]   ;;  %v4063_v45 = vld [vmem:[#allocation4 + $0x5a0] ss:$16 sps:$4 sm:$0xff]  }
  0x81   :  { %2097 = vmatpush2.bf16.msra.mxu0 %v3985_v56  ;;  %2138 = vmatpush2.bf16.msra.mxu1 %v3988_v57  ;;  %v4026_v56 = vld [vmem:[#allocation4 + $0x684] ss:$16 sps:$4 sm:$0xff]  }
  0x82   :  { %2098 = vmatprep.subr.bf16.mxu0 %v3993_v58  ;;  %2139 = vmatprep.subr.bf16.mxu1 %v3996_v59 }
  0x85   :  { %2099 = vmatpush2.bf16.msra.mxu0 %v3991_v60  ;;  %2140 = vmatpush2.bf16.msra.mxu1 %v3994_v61  ;;  %v4021_v60 = vld [vmem:[#allocation4 + $0x480] ss:$16 sps:$4 sm:$0xff]  }
  0x86   :  { %2100 = vmatprep.subr.bf16.mxu0 %v3999_v62  ;;  %2141 = vmatprep.subr.bf16.mxu1 %v4002_v63  ;;  %v4024_v61 = vld [vmem:[#allocation4 + $0x680] ss:$16 sps:$4 sm:$0xff]  }
  0x89   :  { %2101 = vmatpush2.bf16.msra.mxu0 %v3997_v1  ;;  %2142 = vmatpush2.bf16.msra.mxu1 %v4000_v2  ;;  %v4029_v1 = vld [vmem:[#allocation4 + $0x464] ss:$16 sps:$4 sm:$0xff]  }
  0x8a   :  { %2152 = vmatprep.subr.bf16.mxu0 %v4005_v3  ;;  %2193 = vmatprep.subr.bf16.mxu1 %v4008_v4  ;;  %v4032_v4 = vld [vmem:[#allocation4 + $0x664] ss:$16 sps:$4 sm:$0xff]  }
  0xfc   :  { %v350_v14 = vpop.f32.mrf.mxu0  ;;  %v391_v17 = vpop.f32.mrf.mxu1 }
  0xfd   :  { %v351_v16 = vadd.f32 %v350_v14, %v115_v11  ;;  %v392_v18 = vadd.f32 %v391_v17, %v123_v12  ;;  %v4027_v14 = vld [vmem:[#allocation4 + $0x460] ss:$16 sps:$4 sm:$0xff]  }
  0xfe   :  { %v352_v19 = vpop.f32.mrf.mxu0  ;;  %v393_v22 = vpop.f32.mrf.mxu1  ;;  %v4030_v17 = vld [vmem:[#allocation4 + $0x660] ss:$16 sps:$4 sm:$0xff]  }
  0xff   :  { %vm480_vm1 = vcmp.ge.f32.partialorder %v351_v16, 0.0  ;;  %v488_v20 = vmul.f32 0.01, %v351_v16  ;;  %v353_v21 = vadd.f32 %v352_v19, %v119_v13  ;;  %vm482_vm2 = vcmp.ge.f32.partialorder %v392_v18, 0.0 }
 0x100   :  { %v490_v23 = vmul.f32 0.01, %v392_v18  ;;  %v394_v24 = vadd.f32 %v393_v22, %v127_v15  ;;  %v354_v25 = vpop.f32.mrf.mxu0  ;;  %v395_v27 = vpop.f32.mrf.mxu1  ;;  %v4036_v22 = vld [vmem:[#allocation4 + $0x640] ss:$16 sps:$4 sm:$0xff]  }
 0x101   :  { %vm481_vm3 = vcmp.ge.f32.partialorder %v353_v21, 0.0  ;;  %v489_v26 = vmul.f32 0.01, %v353_v21  ;;  %v496_v28 = vsel %vm480_vm1, %v351_v16, %v488_v20  ;;  %v4038_v20 = vld [vmem:[#allocation4 + $0x644] ss:$16 sps:$4 sm:$0xff]  }
 0x102   :  { %vm483_vm4 = vcmp.ge.f32.partialorder %v394_v24, 0.0  ;;  %v491_v29 = vmul.f32 0.01, %v394_v24  ;;  %v355_v30 = vpop.f32.mrf.mxu0  ;;  %v498_v31 = vsel %vm482_vm2, %v392_v18, %v490_v23  ;;  %v396_v32 = vpop.f32.mrf.mxu1  ;;  %v4595_v37 = vpack.c.bf16 %v496_v28, %v496_v28  ;;  %v4035_v18 = vld [vmem:[#allocation4 + $0x444] ss:$16 sps:$4 sm:$0xff]  }
 0x103   :  { %v497_v33 = vsel %vm481_vm3, %v353_v21, %v489_v26  ;;  %v4599_v41 = vpack.c.bf16 %v498_v31, %v498_v31  ;;  %v4033_v21 = vld [vmem:[#allocation4 + $0x440] ss:$16 sps:$4 sm:$0xff]   ;;  %v4041_v23 = vld [vmem:[#allocation4 + $0x424] ss:$16 sps:$4 sm:$0xff]   ;;  %vm3303_vm3 = vcmask 261120  }
 0x104   :  { %v4593_v34 = vpack.c.bf16 %v497_v33, %v497_v33  ;;  %v499_v35 = vsel %vm483_vm4, %v394_v24, %v491_v29  ;;  %v4044_v24 = vld [vmem:[#allocation4 + $0x624] ss:$16 sps:$4 sm:$0xff]   ;;  %v4039_v25 = vld [vmem:[#allocation4 + $0x420] ss:$16 sps:$4 sm:$0xff]   ;;  %vm3363_vm4 = vcmask 1043456  }
 0x105   :  { %v4597_v38 = vpack.c.bf16 %v499_v35, %v499_v35  ;;  %v4042_v26 = vld [vmem:[#allocation4 + $0x620] ss:$16 sps:$4 sm:$0xff]   ;;  %v4047_v27 = vld [vmem:[#allocation4 + $0x404] ss:$16 sps:$4 sm:$0xff]  }
 0x106   :  { %2102 = vmatprep.mubr.bf16.mxu0 %v4593_v34  ;;  %v4050_v28 = vld [vmem:[#allocation4 + $0x604] ss:$16 sps:$4 sm:$0xff]   ;;  %v4045_v29 = vld [vmem:[#allocation4 + $0x400] ss:$16 sps:$4 sm:$0xff]  }
 0x107   :  { %2143 = vmatprep.mubr.bf16.mxu1 %v4597_v38  ;;  %2103 = vmatmul.mubr.bf16.vlgmr.msra.gmra.mxu0 %v4595_v37  ;;  %v4048_v30 = vld [vmem:[#allocation4 + $0x600] ss:$16 sps:$4 sm:$0xff]   ;;  %v4053_v31 = vld [vmem:[#allocation4 + $0x5e4] ss:$16 sps:$4 sm:$0xff]  }
 0x108   :  { %2144 = vmatmul.mubr.bf16.vlgmr.msra.gmra.mxu1 %v4599_v41  ;;  %2153 = vmatpush1.bf16.msra.mxu0 %v4003_v36  ;;  %v4056_v32 = vld [vmem:[#allocation4 + $0x7e4] ss:$16 sps:$4 sm:$0xff]   ;;  %v4051_v33 = vld [vmem:[#allocation4 + $0x5e0] ss:$16 sps:$4 sm:$0xff]  }
 0x109   :  { %2194 = vmatpush1.bf16.msra.mxu1 %v4006_v39  ;;  %2154 = vmatprep.subr.bf16.mxu0 %v4011_v40  ;;  %v4054_v35 = vld [vmem:[#allocation4 + $0x7e0] ss:$16 sps:$4 sm:$0xff]   ;;  %v4059_v36 = vld [vmem:[#allocation4 + $0x5c4] ss:$16 sps:$4 sm:$0xff]  }
 0x10a   :  { %2195 = vmatprep.subr.bf16.mxu1 %v4014_v42  ;;  %v4062_v39 = vld [vmem:[#allocation4 + $0x7c4] ss:$16 sps:$4 sm:$0xff]   ;;  %v4057_v40 = vld [vmem:[#allocation4 + $0x5c0] ss:$16 sps:$4 sm:$0xff]  }
 0x10b   :  { %v4060_v42 = vld [vmem:[#allocation4 + $0x7c0] ss:$16 sps:$4 sm:$0xff]  }
 0x10c   :  { %2155 = vmatpush1.bf16.msra.mxu0 %v4009_v44  ;;  %v4608_v51 = vpop.f32.mrf.mxu0  ;;  %v4611_v55 = vpop.f32.mrf.mxu1  ;;  %v4068_v44 = vld [vmem:[#allocation4 + $0x7a4] ss:$16 sps:$4 sm:$0xff]  }
 0x10d   :  { %2196 = vmatpush1.bf16.msra.mxu1 %v4012_v46  ;;  %2156 = vmatprep.subr.bf16.mxu0 %v4017_v47  ;;  %v4066_v46 = vld [vmem:[#allocation4 + $0x7a0] ss:$16 sps:$4 sm:$0xff]   ;;  %v4071_v47 = vld [vmem:[#allocation4 + $0x584] ss:$16 sps:$4 sm:$0xff]  }
 0x10e   :  { %2197 = vmatprep.subr.bf16.mxu1 %v4020_v48  ;;  %v434_v57 = vpop.f32.mrf.mxu0  ;;  %v475_v59 = vpop.f32.mrf.mxu1  ;;  %v4074_v48 = vld [vmem:[#allocation4 + $0x784] ss:$16 sps:$4 sm:$0xff]  }
 0x10f   :  { %v435_v58 = vadd.f32 %v434_v57, %v135_v49  ;;  %v476_v63 = vadd.f32 %v475_v59, %v143_v52  ;;  %v4069_v49 = vld [vmem:[#allocation4 + $0x580] ss:$16 sps:$4 sm:$0xff]   ;;  %v4077_v52 = vld [vmem:[#allocation4 + $0x564] ss:$16 sps:$4 sm:$0xff]  }
 0x110   :  { %2157 = vmatpush1.bf16.msra.mxu0 %v4015_v50  ;;  %v436_v62 = vpop.f32.mrf.mxu0  ;;  %v477_v3 = vpop.f32.mrf.mxu1  ;;  %v4072_v50 = vld [vmem:[#allocation4 + $0x780] ss:$16 sps:$4 sm:$0xff]   ;;  %v4083_v59 = vld [vmem:[#allocation4 + $0x544] ss:$16 sps:$4 sm:$0xff]  }
 0x111   :  { %2198 = vmatpush1.bf16.msra.mxu1 %v4018_v53  ;;  %2158 = vmatprep.subr.bf16.mxu0 %v4023_v54  ;;  %vm485_vm5 = vcmp.ge.f32.partialorder %v435_v58, 0.0  ;;  %v493_v2 = vmul.f32 0.01, %v435_v58  ;;  %vm487_vm6 = vcmp.ge.f32.partialorder %v476_v63, 0.0  ;;  %v495_v5 = vmul.f32 0.01, %v476_v63 }
 0x112   :  { %2199 = vmatprep.subr.bf16.mxu1 %v4026_v56  ;;  %v437_v11 = vpop.f32.mrf.mxu0  ;;  %v478_v12 = vpop.f32.mrf.mxu1  ;;  %v130_v53 = vsub.s32 4, %v4568_v0  ;;  %v4080_v54 = vld [vmem:[#allocation4 + $0x764] ss:$16 sps:$4 sm:$0xff]   ;;  %v138_v56 = vsub.s32 6, %v4568_v0  ;;  %v4075_v57 = vld [vmem:[#allocation4 + $0x560] ss:$16 sps:$4 sm:$0xff]  }
 0x113   :  { %v501_v13 = vsel %vm485_vm5, %v435_v58, %v493_v2  ;;  %v503_v16 = vsel %vm487_vm6, %v476_v63, %v495_v5  ;;  %v4078_v58 = vld [vmem:[#allocation4 + $0x760] ss:$16 sps:$4 sm:$0xff]   ;;  %v4089_v2 = vld [vmem:[#allocation4 + $0x524] ss:$16 sps:$4 sm:$0xff]   ;;  %vm3359_vm6 = vcmask 64512  }
 0x114   :  { %2159 = vmatpush1.bf16.msra.mxu0 %v4021_v60  ;;  %v4613_v15 = vpack.c.bf16 %v501_v13, %v501_v13  ;;  %v4615_v19 = vpack.c.bf16 %v503_v16, %v503_v16  ;;  %v131_v60 = vrot.slane %v4576_v7, %v130_v53  ;;  %v139_v62 = vrot.slane %v4576_v7, %v138_v56  ;;  %v4081_v63 = vld [vmem:[#allocation4 + $0x540] ss:$16 sps:$4 sm:$0xff]   ;;  %v4095_v13 = vld [vmem:[#allocation4 + $0x504] ss:$16 sps:$4 sm:$0xff]   ;;  %v4143_v53 = vld [vmem:[#allocation4 + $0xc] ss:$16 sps:$4 sm:$0xff]  }
 0x115   :  { %2200 = vmatpush1.bf16.msra.mxu1 %v4024_v61  ;;  %2160 = vmatprep.subr.bf16.mxu0 %v4029_v1  ;;  %v4086_v61 = vld [vmem:[#allocation4 + $0x744] ss:$16 sps:$4 sm:$0xff]   ;;  %v4084_v1 = vld [vmem:[#allocation4 + $0x740] ss:$16 sps:$4 sm:$0xff]   ;;  %v4141_v56 = vld [vmem:[#allocation4 + $0x8] ss:$16 sps:$4 sm:$0xff]  }
 0x116   :  { %2201 = vmatprep.subr.bf16.mxu1 %v4032_v4  ;;  %2184 = vmatprep.mubr.bf16.mxu0 %v4613_v15  ;;  %v433_v3 = vadd.f32 %v4608_v51, %v131_v60  ;;  %v4092_v4 = vld [vmem:[#allocation4 + $0x724] ss:$16 sps:$4 sm:$0xff]   ;;  %v474_v5 = vadd.f32 %v4611_v55, %v139_v62  ;;  %v4087_v11 = vld [vmem:[#allocation4 + $0x520] ss:$16 sps:$4 sm:$0xff]   ;;  %v4104_v55 = vld [vmem:[#allocation4 + $0x2ec] ss:$16 sps:$4 sm:$0xff]  }
 0x117   :  { %2225 = vmatprep.mubr.bf16.mxu1 %v4615_v19  ;;  %v4090_v12 = vld [vmem:[#allocation4 + $0x720] ss:$16 sps:$4 sm:$0xff]   ;;  %v4098_v7 = vld [vmem:[#allocation4 + $0x704] ss:$16 sps:$4 sm:$0xff]   ;;  %v4147_v60 = vld [vmem:[#allocation4 + $0x1e8] ss:$16 sps:$4 sm:$0xff]  }
 0x118   :  { %2161 = vmatpush1.bf16.msra.mxu0 %v4027_v14  ;;  %v492_v14 = vmul.f32 0.01, %v433_v3  ;;  %vm484_vm7 = vcmp.ge.f32.partialorder %v433_v3, 0.0  ;;  %v494_v16 = vmul.f32 0.01, %v474_v5  ;;  %vm486_vm8 = vcmp.ge.f32.partialorder %v474_v5, 0.0 }
 0x119   :  { %2202 = vmatpush1.bf16.msra.mxu1 %v4030_v17  ;;  %2162 = vmatprep.subr.bf16.mxu0 %v4035_v18  ;;  %v4093_v17 = vld [vmem:[#allocation4 + $0x500] ss:$16 sps:$4 sm:$0xff]   ;;  %v4101_v18 = vld [vmem:[#allocation4 + $0xec] ss:$16 sps:$4 sm:$0xff]  }
 0x11a   :  { %2203 = vmatprep.subr.bf16.mxu1 %v4038_v20  ;;  %v4096_v51 = vld [vmem:[#allocation4 + $0x700] ss:$16 sps:$4 sm:$0xff]   ;;  %v500_v20 = vsel %vm484_vm7, %v433_v3, %v492_v14  ;;  %v4155_v62 = vld [vmem:[#allocation4 + $0x1cc] ss:$16 sps:$4 sm:$0xff]   ;;  %v4165_v14 = vld [vmem:[#allocation4 + $0x188] ss:$16 sps:$4 sm:$0xff]  }
 0x11b   :  { %v4161_v3 = vld [vmem:[#allocation4 + $0x1ac] ss:$16 sps:$4 sm:$0xff]  }
 0x11c   :  { %2163 = vmatpush1.bf16.msra.mxu0 %v4033_v21  ;;  %v502_v21 = vsel %vm486_vm8, %v474_v5, %v494_v16  ;;  %v4159_v5 = vld [vmem:[#allocation4 + $0x1a8] ss:$16 sps:$4 sm:$0xff]   ;;  %v4173_v16 = vld [vmem:[#allocation4 + $0x16c] ss:$16 sps:$4 sm:$0xff]  }
 0x11d   :  { %2204 = vmatpush1.bf16.msra.mxu1 %v4036_v22  ;;  %2164 = vmatprep.subr.bf16.mxu0 %v4041_v23  ;;  %v4099_v22 = vld [vmem:[#allocation4 + $0xe8] ss:$16 sps:$4 sm:$0xff]   ;;  %v4625_v23 = vpack.c.bf16 %v500_v20, %v500_v20  ;;  %v4179_v20 = vld [vmem:[#allocation4 + $0x14c] ss:$16 sps:$4 sm:$0xff]  }
 0x11e   :  { %2205 = vmatprep.subr.bf16.mxu1 %v4044_v24  ;;  %v4102_v24 = vld [vmem:[#allocation4 + $0x2e8] ss:$16 sps:$4 sm:$0xff]  }
 0x120   :  { %2165 = vmatpush1.bf16.msra.mxu0 %v4039_v25  ;;  %v4627_v25 = vpack.c.bf16 %v502_v21, %v502_v21  ;;  %v4177_v21 = vld [vmem:[#allocation4 + $0x148] ss:$16 sps:$4 sm:$0xff]  }
 0x121   :  { %2206 = vmatpush1.bf16.msra.mxu1 %v4042_v26  ;;  %2166 = vmatprep.subr.bf16.mxu0 %v4047_v27  ;;  %v4107_v26 = vld [vmem:[#allocation4 + $0xcc] ss:$16 sps:$4 sm:$0xff]  }
 0x122   :  { %2207 = vmatprep.subr.bf16.mxu1 %v4050_v28  ;;  %v4110_v27 = vld [vmem:[#allocation4 + $0x2cc] ss:$16 sps:$4 sm:$0xff]   ;;  %v4105_v28 = vld [vmem:[#allocation4 + $0xc8] ss:$16 sps:$4 sm:$0xff]  }
 0x124   :  { %2167 = vmatpush1.bf16.msra.mxu0 %v4045_v29  ;;  %v4108_v29 = vld [vmem:[#allocation4 + $0x2c8] ss:$16 sps:$4 sm:$0xff]  }
 0x125   :  { %2208 = vmatpush1.bf16.msra.mxu1 %v4048_v30  ;;  %2168 = vmatprep.subr.bf16.mxu0 %v4053_v31  ;;  %v4113_v30 = vld [vmem:[#allocation4 + $0xac] ss:$16 sps:$4 sm:$0xff]  }
 0x126   :  { %2209 = vmatprep.subr.bf16.mxu1 %v4056_v32  ;;  %v4116_v31 = vld [vmem:[#allocation4 + $0x2ac] ss:$16 sps:$4 sm:$0xff]   ;;  %v4111_v32 = vld [vmem:[#allocation4 + $0xa8] ss:$16 sps:$4 sm:$0xff]  }
 0x128   :  { %2169 = vmatpush2.bf16.msra.mxu0 %v4051_v33  ;;  %v4114_v33 = vld [vmem:[#allocation4 + $0x2a8] ss:$16 sps:$4 sm:$0xff]  }
 0x129   :  { %2210 = vmatpush2.bf16.msra.mxu1 %v4054_v35  ;;  %2170 = vmatprep.subr.bf16.mxu0 %v4059_v36  ;;  %v4119_v35 = vld [vmem:[#allocation4 + $0x8c] ss:$16 sps:$4 sm:$0xff]  }
 0x12a   :  { %2211 = vmatprep.subr.bf16.mxu1 %v4062_v39  ;;  %v4122_v36 = vld [vmem:[#allocation4 + $0x28c] ss:$16 sps:$4 sm:$0xff]   ;;  %v4117_v39 = vld [vmem:[#allocation4 + $0x88] ss:$16 sps:$4 sm:$0xff]  }
 0x12c   :  { %2171 = vmatpush2.bf16.msra.mxu0 %v4057_v40  ;;  %v4125_v40 = vld [vmem:[#allocation4 + $0x6c] ss:$16 sps:$4 sm:$0xff]  }
 0x12d   :  { %2212 = vmatpush2.bf16.msra.mxu1 %v4060_v42  ;;  %2172 = vmatprep.subr.bf16.mxu0 %v4065_v43  ;;  %v4128_v42 = vld [vmem:[#allocation4 + $0x26c] ss:$16 sps:$4 sm:$0xff]   ;;  %v4126_v43 = vld [vmem:[#allocation4 + $0x268] ss:$16 sps:$4 sm:$0xff]  }
 0x12e   :  { %2213 = vmatprep.subr.bf16.mxu1 %v4068_v44  ;;  %v4131_v44 = vld [vmem:[#allocation4 + $0x4c] ss:$16 sps:$4 sm:$0xff]  }
 0x130   :  { %2173 = vmatpush2.bf16.msra.mxu0 %v4063_v45  ;;  %v4134_v45 = vld [vmem:[#allocation4 + $0x24c] ss:$16 sps:$4 sm:$0xff]  }
 0x131   :  { %2214 = vmatpush2.bf16.msra.mxu1 %v4066_v46  ;;  %2174 = vmatprep.subr.bf16.mxu0 %v4071_v47  ;;  %v4129_v46 = vld [vmem:[#allocation4 + $0x48] ss:$16 sps:$4 sm:$0xff]  }
 0x132   :  { %2215 = vmatprep.subr.bf16.mxu1 %v4074_v48  ;;  %v4132_v47 = vld [vmem:[#allocation4 + $0x248] ss:$16 sps:$4 sm:$0xff]   ;;  %v4137_v48 = vld [vmem:[#allocation4 + $0x2c] ss:$16 sps:$4 sm:$0xff]  }
 0x134   :  { %2175 = vmatpush2.bf16.msra.mxu0 %v4069_v49  ;;  %v4140_v49 = vld [vmem:[#allocation4 + $0x22c] ss:$16 sps:$4 sm:$0xff]  }
 0x135   :  { %2216 = vmatpush2.bf16.msra.mxu1 %v4072_v50  ;;  %2176 = vmatprep.subr.bf16.mxu0 %v4077_v52  ;;  %v4135_v50 = vld [vmem:[#allocation4 + $0x28] ss:$16 sps:$4 sm:$0xff]  }
 0x136   :  { %2217 = vmatprep.subr.bf16.mxu1 %v4080_v54  ;;  %v4138_v52 = vld [vmem:[#allocation4 + $0x228] ss:$16 sps:$4 sm:$0xff]   ;;  %v4146_v54 = vld [vmem:[#allocation4 + $0x20c] ss:$16 sps:$4 sm:$0xff]  }
 0x138   :  { %2177 = vmatpush2.bf16.msra.mxu0 %v4075_v57  ;;  %v4144_v57 = vld [vmem:[#allocation4 + $0x208] ss:$16 sps:$4 sm:$0xff]  }
 0x139   :  { %2218 = vmatpush2.bf16.msra.mxu1 %v4078_v58  ;;  %2178 = vmatprep.subr.bf16.mxu0 %v4083_v59  ;;  %v4149_v58 = vld [vmem:[#allocation4 + $0x1ec] ss:$16 sps:$4 sm:$0xff]  }
 0x13a   :  { %2219 = vmatprep.subr.bf16.mxu1 %v4086_v61  ;;  %v4152_v59 = vld [vmem:[#allocation4 + $0x3ec] ss:$16 sps:$4 sm:$0xff]   ;;  %v4150_v61 = vld [vmem:[#allocation4 + $0x3e8] ss:$16 sps:$4 sm:$0xff]  }
 0x13c   :  { %2179 = vmatpush2.bf16.msra.mxu0 %v4081_v63  ;;  %v4158_v63 = vld [vmem:[#allocation4 + $0x3cc] ss:$16 sps:$4 sm:$0xff]  }
 0x13d   :  { %2220 = vmatpush2.bf16.msra.mxu1 %v4084_v1  ;;  %2180 = vmatprep.subr.bf16.mxu0 %v4089_v2  ;;  %v4153_v1 = vld [vmem:[#allocation4 + $0x1c8] ss:$16 sps:$4 sm:$0xff]  }
 0x13e   :  { %2221 = vmatprep.subr.bf16.mxu1 %v4092_v4  ;;  %v4156_v2 = vld [vmem:[#allocation4 + $0x3c8] ss:$16 sps:$4 sm:$0xff]   ;;  %v4164_v4 = vld [vmem:[#allocation4 + $0x3ac] ss:$16 sps:$4 sm:$0xff]  }
 0x140   :  { %2181 = vmatpush2.bf16.msra.mxu0 %v4087_v11  ;;  %v4162_v11 = vld [vmem:[#allocation4 + $0x3a8] ss:$16 sps:$4 sm:$0xff]  }
 0x141   :  { %2222 = vmatpush2.bf16.msra.mxu1 %v4090_v12  ;;  %2182 = vmatprep.subr.bf16.mxu0 %v4095_v13  ;;  %v4167_v12 = vld [vmem:[#allocation4 + $0x18c] ss:$16 sps:$4 sm:$0xff]  }
 0x142   :  { %2223 = vmatprep.subr.bf16.mxu1 %v4098_v7  ;;  %v4170_v13 = vld [vmem:[#allocation4 + $0x38c] ss:$16 sps:$4 sm:$0xff]   ;;  %v4168_v7 = vld [vmem:[#allocation4 + $0x388] ss:$16 sps:$4 sm:$0xff]  }
 0x144   :  { %2183 = vmatpush2.bf16.msra.mxu0 %v4093_v17  ;;  %v4176_v17 = vld [vmem:[#allocation4 + $0x36c] ss:$16 sps:$4 sm:$0xff]  }
 0x145   :  { %2224 = vmatpush2.bf16.msra.mxu1 %v4096_v51  ;;  %2234 = vmatprep.subr.bf16.mxu0 %v4101_v18  ;;  %v4171_v51 = vld [vmem:[#allocation4 + $0x168] ss:$16 sps:$4 sm:$0xff]  }
 0x146   :  { %2275 = vmatprep.subr.bf16.mxu1 %v4104_v55  ;;  %v4174_v18 = vld [vmem:[#allocation4 + $0x368] ss:$16 sps:$4 sm:$0xff]   ;;  %v4182_v55 = vld [vmem:[#allocation4 + $0x34c] ss:$16 sps:$4 sm:$0xff]  }
 0x147   :  { %2185 = vmatmul.mubr.bf16.vlgmr.msra.gmra.mxu0 %v4625_v23 }
 0x148   :  { %2226 = vmatmul.mubr.bf16.vlgmr.msra.gmra.mxu1 %v4627_v25  ;;  %2235 = vmatpush1.bf16.msra.mxu0 %v4099_v22  ;;  %v4180_v22 = vld [vmem:[#allocation4 + $0x348] ss:$16 sps:$4 sm:$0xff]  }
 0x149   :  { %2266 = vmatprep.mubr.bf16.mxu0 %v4593_v34  ;;  %2276 = vmatpush1.bf16.msra.mxu1 %v4102_v24  ;;  %v4120_v34 = vld [vmem:[#allocation4 + $0x288] ss:$16 sps:$4 sm:$0xff]   ;;  %v4185_v24 = vld [vmem:[#allocation4 + $0x12c] ss:$16 sps:$4 sm:$0xff]  }
 0x14a   :  { %2307 = vmatprep.mubr.bf16.mxu1 %v4597_v38  ;;  %2236 = vmatprep.subr.bf16.mxu0 %v4107_v26  ;;  %v4123_v38 = vld [vmem:[#allocation4 + $0x68] ss:$16 sps:$4 sm:$0xff]   ;;  %v4188_v26 = vld [vmem:[#allocation4 + $0x32c] ss:$16 sps:$4 sm:$0xff]  }
 0x14b   :  { %2277 = vmatprep.subr.bf16.mxu1 %v4110_v27  ;;  %v4183_v27 = vld [vmem:[#allocation4 + $0x128] ss:$16 sps:$4 sm:$0xff]  }
 0x14c   :  { %2237 = vmatpush1.bf16.msra.mxu0 %v4105_v28  ;;  %v4186_v28 = vld [vmem:[#allocation4 + $0x328] ss:$16 sps:$4 sm:$0xff]  }
 0x14d   :  { %2278 = vmatpush1.bf16.msra.mxu1 %v4108_v29  ;;  %2238 = vmatprep.subr.bf16.mxu0 %v4113_v30  ;;  %v4191_v29 = vld [vmem:[#allocation4 + $0x10c] ss:$16 sps:$4 sm:$0xff]  }
 0x14e   :  { %2279 = vmatprep.subr.bf16.mxu1 %v4116_v31  ;;  %v4194_v30 = vld [vmem:[#allocation4 + $0x30c] ss:$16 sps:$4 sm:$0xff]   ;;  %v4189_v31 = vld [vmem:[#allocation4 + $0x108] ss:$16 sps:$4 sm:$0xff]  }
 0x150   :  { %2239 = vmatpush1.bf16.msra.mxu0 %v4111_v32  ;;  %v4192_v32 = vld [vmem:[#allocation4 + $0x308] ss:$16 sps:$4 sm:$0xff]  }
 0x151   :  { %2280 = vmatpush1.bf16.msra.mxu1 %v4114_v33  ;;  %2240 = vmatprep.subr.bf16.mxu0 %v4119_v35  ;;  %v4197_v33 = vld [vmem:[#allocation4 + $0x4ec] ss:$16 sps:$4 sm:$0xff]  }
 0x152   :  { %2281 = vmatprep.subr.bf16.mxu1 %v4122_v36  ;;  %v4200_v35 = vld [vmem:[#allocation4 + $0x6ec] ss:$16 sps:$4 sm:$0xff]   ;;  %v4195_v36 = vld [vmem:[#allocation4 + $0x4e8] ss:$16 sps:$4 sm:$0xff]  }
 0x154   :  { %2241 = vmatpush1.bf16.msra.mxu0 %v4117_v39  ;;  %v4198_v39 = vld [vmem:[#allocation4 + $0x6e8] ss:$16 sps:$4 sm:$0xff]  }
 0x155   :  { %2282 = vmatpush1.bf16.msra.mxu1 %v4120_v34  ;;  %2242 = vmatprep.subr.bf16.mxu0 %v4125_v40  ;;  %v4203_v34 = vld [vmem:[#allocation4 + $0x4cc] ss:$16 sps:$4 sm:$0xff]  }
 0x156   :  { %2283 = vmatprep.subr.bf16.mxu1 %v4128_v42  ;;  %v4206_v40 = vld [vmem:[#allocation4 + $0x6cc] ss:$16 sps:$4 sm:$0xff]   ;;  %v4201_v42 = vld [vmem:[#allocation4 + $0x4c8] ss:$16 sps:$4 sm:$0xff]  }
 0x158   :  { %2243 = vmatpush1.bf16.msra.mxu0 %v4123_v38  ;;  %v4204_v38 = vld [vmem:[#allocation4 + $0x6c8] ss:$16 sps:$4 sm:$0xff]  }
 0x159   :  { %2284 = vmatpush1.bf16.msra.mxu1 %v4126_v43  ;;  %2244 = vmatprep.subr.bf16.mxu0 %v4131_v44  ;;  %v4209_v43 = vld [vmem:[#allocation4 + $0x4ac] ss:$16 sps:$4 sm:$0xff]  }
 0x15a   :  { %2285 = vmatprep.subr.bf16.mxu1 %v4134_v45  ;;  %v4212_v44 = vld [vmem:[#allocation4 + $0x6ac] ss:$16 sps:$4 sm:$0xff]   ;;  %v4207_v45 = vld [vmem:[#allocation4 + $0x4a8] ss:$16 sps:$4 sm:$0xff]  }
 0x15c   :  { %2245 = vmatpush1.bf16.msra.mxu0 %v4129_v46  ;;  %v4215_v46 = vld [vmem:[#allocation4 + $0x48c] ss:$16 sps:$4 sm:$0xff]  }
 0x15d   :  { %2286 = vmatpush1.bf16.msra.mxu1 %v4132_v47  ;;  %2246 = vmatprep.subr.bf16.mxu0 %v4137_v48  ;;  %v4213_v47 = vld [vmem:[#allocation4 + $0x488] ss:$16 sps:$4 sm:$0xff]   ;;  %v4221_v48 = vld [vmem:[#allocation4 + $0x46c] ss:$16 sps:$4 sm:$0xff]  }
 0x15e   :  { %2287 = vmatprep.subr.bf16.mxu1 %v4140_v49  ;;  %v4224_v49 = vld [vmem:[#allocation4 + $0x66c] ss:$16 sps:$4 sm:$0xff]  }
 0x160   :  { %2247 = vmatpush1.bf16.msra.mxu0 %v4135_v50  ;;  %v4222_v50 = vld [vmem:[#allocation4 + $0x668] ss:$16 sps:$4 sm:$0xff]  }
 0x161   :  { %2288 = vmatpush1.bf16.msra.mxu1 %v4138_v52  ;;  %2248 = vmatprep.subr.bf16.mxu0 %v4143_v53  ;;  %v4227_v52 = vld [vmem:[#allocation4 + $0x44c] ss:$16 sps:$4 sm:$0xff]  }
 0x162   :  { %2289 = vmatprep.subr.bf16.mxu1 %v4146_v54  ;;  %v4230_v53 = vld [vmem:[#allocation4 + $0x64c] ss:$16 sps:$4 sm:$0xff]   ;;  %v4225_v54 = vld [vmem:[#allocation4 + $0x448] ss:$16 sps:$4 sm:$0xff]  }
 0x164   :  { %2249 = vmatpush1.bf16.msra.mxu0 %v4141_v56  ;;  %v4228_v56 = vld [vmem:[#allocation4 + $0x648] ss:$16 sps:$4 sm:$0xff]  }
 0x165   :  { %2290 = vmatpush1.bf16.msra.mxu1 %v4144_v57  ;;  %2250 = vmatprep.subr.bf16.mxu0 %v4149_v58  ;;  %v4233_v57 = vld [vmem:[#allocation4 + $0x42c] ss:$16 sps:$4 sm:$0xff]  }
 0x166   :  { %2291 = vmatprep.subr.bf16.mxu1 %v4152_v59  ;;  %v4236_v58 = vld [vmem:[#allocation4 + $0x62c] ss:$16 sps:$4 sm:$0xff]   ;;  %v4231_v59 = vld [vmem:[#allocation4 + $0x428] ss:$16 sps:$4 sm:$0xff]  }
 0x168   :  { %2251 = vmatpush2.bf16.msra.mxu0 %v4147_v60  ;;  %v4234_v60 = vld [vmem:[#allocation4 + $0x628] ss:$16 sps:$4 sm:$0xff]  }
 0x169   :  { %2292 = vmatpush2.bf16.msra.mxu1 %v4150_v61  ;;  %2252 = vmatprep.subr.bf16.mxu0 %v4155_v62  ;;  %v4239_v61 = vld [vmem:[#allocation4 + $0x40c] ss:$16 sps:$4 sm:$0xff]  }
 0x16a   :  { %2293 = vmatprep.subr.bf16.mxu1 %v4158_v63  ;;  %v4242_v62 = vld [vmem:[#allocation4 + $0x60c] ss:$16 sps:$4 sm:$0xff]   ;;  %v4237_v63 = vld [vmem:[#allocation4 + $0x408] ss:$16 sps:$4 sm:$0xff]  }
 0x16c   :  { %2253 = vmatpush2.bf16.msra.mxu0 %v4153_v1  ;;  %v4240_v1 = vld [vmem:[#allocation4 + $0x608] ss:$16 sps:$4 sm:$0xff]  }
 0x16d   :  { %2294 = vmatpush2.bf16.msra.mxu1 %v4156_v2  ;;  %2254 = vmatprep.subr.bf16.mxu0 %v4161_v3  ;;  %v4245_v2 = vld [vmem:[#allocation4 + $0x5ec] ss:$16 sps:$4 sm:$0xff]  }
 0x16e   :  { %2295 = vmatprep.subr.bf16.mxu1 %v4164_v4  ;;  %v4248_v3 = vld [vmem:[#allocation4 + $0x7ec] ss:$16 sps:$4 sm:$0xff]   ;;  %v4243_v4 = vld [vmem:[#allocation4 + $0x5e8] ss:$16 sps:$4 sm:$0xff]  }
 0x170   :  { %2255 = vmatpush2.bf16.msra.mxu0 %v4159_v5  ;;  %v4246_v5 = vld [vmem:[#allocation4 + $0x7e8] ss:$16 sps:$4 sm:$0xff]  }
 0x171   :  { %2296 = vmatpush2.bf16.msra.mxu1 %v4162_v11  ;;  %2256 = vmatprep.subr.bf16.mxu0 %v4167_v12  ;;  %v4251_v11 = vld [vmem:[#allocation4 + $0x5cc] ss:$16 sps:$4 sm:$0xff]  }
 0x172   :  { %2297 = vmatprep.subr.bf16.mxu1 %v4170_v13  ;;  %v4254_v12 = vld [vmem:[#allocation4 + $0x7cc] ss:$16 sps:$4 sm:$0xff]   ;;  %v4249_v13 = vld [vmem:[#allocation4 + $0x5c8] ss:$16 sps:$4 sm:$0xff]  }
 0x174   :  { %2257 = vmatpush2.bf16.msra.mxu0 %v4165_v14  ;;  %v4252_v14 = vld [vmem:[#allocation4 + $0x7c8] ss:$16 sps:$4 sm:$0xff]  }
 0x175   :  { %2298 = vmatpush2.bf16.msra.mxu1 %v4168_v7  ;;  %2258 = vmatprep.subr.bf16.mxu0 %v4173_v16  ;;  %v4257_v7 = vld [vmem:[#allocation4 + $0x5ac] ss:$16 sps:$4 sm:$0xff]  }
 0x176   :  { %2299 = vmatprep.subr.bf16.mxu1 %v4176_v17  ;;  %v4260_v16 = vld [vmem:[#allocation4 + $0x7ac] ss:$16 sps:$4 sm:$0xff]   ;;  %v4255_v17 = vld [vmem:[#allocation4 + $0x5a8] ss:$16 sps:$4 sm:$0xff]  }
 0x178   :  { %2259 = vmatpush2.bf16.msra.mxu0 %v4171_v51  ;;  %v4258_v51 = vld [vmem:[#allocation4 + $0x7a8] ss:$16 sps:$4 sm:$0xff]  }
 0x179   :  { %2300 = vmatpush2.bf16.msra.mxu1 %v4174_v18  ;;  %2260 = vmatprep.subr.bf16.mxu0 %v4179_v20  ;;  %v4263_v18 = vld [vmem:[#allocation4 + $0x58c] ss:$16 sps:$4 sm:$0xff]  }
 0x17a   :  { %2301 = vmatprep.subr.bf16.mxu1 %v4182_v55  ;;  %v4266_v20 = vld [vmem:[#allocation4 + $0x78c] ss:$16 sps:$4 sm:$0xff]   ;;  %v4261_v55 = vld [vmem:[#allocation4 + $0x588] ss:$16 sps:$4 sm:$0xff]  }
 0x17c   :  { %2261 = vmatpush2.bf16.msra.mxu0 %v4177_v21  ;;  %v4264_v21 = vld [vmem:[#allocation4 + $0x788] ss:$16 sps:$4 sm:$0xff]  }
 0x17d   :  { %2302 = vmatpush2.bf16.msra.mxu1 %v4180_v22  ;;  %2262 = vmatprep.subr.bf16.mxu0 %v4185_v24  ;;  %v4269_v22 = vld [vmem:[#allocation4 + $0x56c] ss:$16 sps:$4 sm:$0xff]  }
 0x17e   :  { %2303 = vmatprep.subr.bf16.mxu1 %v4188_v26  ;;  %v4272_v24 = vld [vmem:[#allocation4 + $0x76c] ss:$16 sps:$4 sm:$0xff]   ;;  %v4267_v26 = vld [vmem:[#allocation4 + $0x568] ss:$16 sps:$4 sm:$0xff]  }
 0x180   :  { %2263 = vmatpush2.bf16.msra.mxu0 %v4183_v27  ;;  %v4270_v27 = vld [vmem:[#allocation4 + $0x768] ss:$16 sps:$4 sm:$0xff]  }
 0x181   :  { %2304 = vmatpush2.bf16.msra.mxu1 %v4186_v28  ;;  %2264 = vmatprep.subr.bf16.mxu0 %v4191_v29  ;;  %v4275_v28 = vld [vmem:[#allocation4 + $0x54c] ss:$16 sps:$4 sm:$0xff]  }
 0x182   :  { %2305 = vmatprep.subr.bf16.mxu1 %v4194_v30  ;;  %v4278_v29 = vld [vmem:[#allocation4 + $0x74c] ss:$16 sps:$4 sm:$0xff]   ;;  %v4273_v30 = vld [vmem:[#allocation4 + $0x548] ss:$16 sps:$4 sm:$0xff]  }
 0x184   :  { %2265 = vmatpush2.bf16.msra.mxu0 %v4189_v31  ;;  %v4276_v31 = vld [vmem:[#allocation4 + $0x748] ss:$16 sps:$4 sm:$0xff]  }
 0x185   :  { %2306 = vmatpush2.bf16.msra.mxu1 %v4192_v32  ;;  %2316 = vmatprep.subr.bf16.mxu0 %v4197_v33  ;;  %v4281_v32 = vld [vmem:[#allocation4 + $0x52c] ss:$16 sps:$4 sm:$0xff]  }
 0x186   :  { %2357 = vmatprep.subr.bf16.mxu1 %v4200_v35  ;;  %v4284_v33 = vld [vmem:[#allocation4 + $0x72c] ss:$16 sps:$4 sm:$0xff]   ;;  %v4279_v35 = vld [vmem:[#allocation4 + $0x528] ss:$16 sps:$4 sm:$0xff]  }
 0x187   :  { %2267 = vmatmul.mubr.bf16.vlgmr.msra.gmra.mxu0 %v4595_v37  ;;  %v4210_v37 = vld [vmem:[#allocation4 + $0x6a8] ss:$16 sps:$4 sm:$0xff]  }
 0x188   :  { %2308 = vmatmul.mubr.bf16.vlgmr.msra.gmra.mxu1 %v4599_v41  ;;  %2317 = vmatpush1.bf16.msra.mxu0 %v4195_v36  ;;  %v4218_v41 = vld [vmem:[#allocation4 + $0x68c] ss:$16 sps:$4 sm:$0xff]   ;;  %v4282_v36 = vld [vmem:[#allocation4 + $0x728] ss:$16 sps:$4 sm:$0xff]  }
 0x189   :  { %2348 = vmatprep.mubr.bf16.mxu0 %v4613_v15  ;;  %2358 = vmatpush1.bf16.msra.mxu1 %v4198_v39  ;;  %v4216_v15 = vld [vmem:[#allocation4 + $0x688] ss:$16 sps:$4 sm:$0xff]   ;;  %v4287_v39 = vld [vmem:[#allocation4 + $0x50c] ss:$16 sps:$4 sm:$0xff]  }
 0x18a   :  { %2389 = vmatprep.mubr.bf16.mxu1 %v4615_v19  ;;  %2318 = vmatprep.subr.bf16.mxu0 %v4203_v34  ;;  %v4219_v19 = vld [vmem:[#allocation4 + $0x468] ss:$16 sps:$4 sm:$0xff]   ;;  %v4290_v34 = vld [vmem:[#allocation4 + $0x70c] ss:$16 sps:$4 sm:$0xff]  }
 0x18b   :  { %2359 = vmatprep.subr.bf16.mxu1 %v4206_v40  ;;  %v4285_v40 = vld [vmem:[#allocation4 + $0x508] ss:$16 sps:$4 sm:$0xff]  }
 0x18c   :  { %2319 = vmatpush1.bf16.msra.mxu0 %v4201_v42  ;;  %v4288_v42 = vld [vmem:[#allocation4 + $0x708] ss:$16 sps:$4 sm:$0xff]  }
 0x18d   :  { %2360 = vmatpush1.bf16.msra.mxu1 %v4204_v38  ;;  %2320 = vmatprep.subr.bf16.mxu0 %v4209_v43  ;;  %v4293_v38 = vld [vmem:[#allocation6 + $0x74] ss:$8 sps:$4 sm:$0xff]   ;;  %v4291_v43 = vld [vmem:[#allocation6 + $0x70] ss:$8 sps:$4 sm:$0xff]  }
 0x18e   :  { %2361 = vmatprep.subr.bf16.mxu1 %v4212_v44  ;;  %v4296_v44 = vld [vmem:[#allocation6 + $0x64] ss:$8 sps:$4 sm:$0xff]  }
 0x190   :  { %2321 = vmatpush1.bf16.msra.mxu0 %v4207_v45 }
 0x191   :  { %2362 = vmatpush1.bf16.msra.mxu1 %v4210_v37  ;;  %2322 = vmatprep.subr.bf16.mxu0 %v4215_v46  ;;  %v4294_v46 = vld [vmem:[#allocation6 + $0x60] ss:$8 sps:$4 sm:$0xff]  }
 0x192   :  { %2363 = vmatprep.subr.bf16.mxu1 %v4218_v41 }
 0x194   :  { %2323 = vmatpush1.bf16.msra.mxu0 %v4213_v47  ;;  %v4299_v47 = vld [vmem:[#allocation6 + $0x54] ss:$8 sps:$4 sm:$0xff]  }
 0x195   :  { %2364 = vmatpush1.bf16.msra.mxu1 %v4216_v15  ;;  %2324 = vmatprep.subr.bf16.mxu0 %v4221_v48 }
 0x196   :  { %2365 = vmatprep.subr.bf16.mxu1 %v4224_v49 }
 0x198   :  { %2325 = vmatpush1.bf16.msra.mxu0 %v4219_v19  ;;  %v4297_v19 = vld [vmem:[#allocation6 + $0x50] ss:$8 sps:$4 sm:$0xff]  }
 0x199   :  { %2366 = vmatpush1.bf16.msra.mxu1 %v4222_v50  ;;  %2326 = vmatprep.subr.bf16.mxu0 %v4227_v52 }
 0x19a   :  { %2367 = vmatprep.subr.bf16.mxu1 %v4230_v53  ;;  %v4339_v53 = vld [vmem:[#allocation6 + $0x170] ss:$8 sps:$4 sm:$0xff]  }
 0x19c   :  { %2327 = vmatpush1.bf16.msra.mxu0 %v4225_v54  ;;  %v4344_v54 = vld [vmem:[#allocation6 + $0x164] ss:$8 sps:$4 sm:$0xff]  }
 0x19d   :  { %2368 = vmatpush1.bf16.msra.mxu1 %v4228_v56  ;;  %2328 = vmatprep.subr.bf16.mxu0 %v4233_v57  ;;  %v4300_v56 = vld [vmem:[#allocation6 + $0x40] ss:$8 sps:$4 sm:$0xff]   ;;  %v4305_v57 = vld [vmem:[#allocation6 + $0x34] ss:$8 sps:$4 sm:$0xff]  }
 0x19e   :  { %2369 = vmatprep.subr.bf16.mxu1 %v4236_v58  ;;  %v4342_v58 = vld [vmem:[#allocation6 + $0x160] ss:$8 sps:$4 sm:$0xff]  }
 0x1a0   :  { %2329 = vmatpush1.bf16.msra.mxu0 %v4231_v59  ;;  %v4347_v59 = vld [vmem:[#allocation6 + $0x154] ss:$8 sps:$4 sm:$0xff]  }
 0x1a1   :  { %2370 = vmatpush1.bf16.msra.mxu1 %v4234_v60  ;;  %2330 = vmatprep.subr.bf16.mxu0 %v4239_v61  ;;  %v4303_v60 = vld [vmem:[#allocation6 + $0x30] ss:$8 sps:$4 sm:$0xff]   ;;  %v4308_v61 = vld [vmem:[#allocation6 + $0x24] ss:$8 sps:$4 sm:$0xff]  }
 0x1a2   :  { %2371 = vmatprep.subr.bf16.mxu1 %v4242_v62  ;;  %v4345_v62 = vld [vmem:[#allocation6 + $0x150] ss:$8 sps:$4 sm:$0xff]  }
 0x1a4   :  { %2331 = vmatpush1.bf16.msra.mxu0 %v4237_v63  ;;  %v4350_v63 = vld [vmem:[#allocation6 + $0x144] ss:$8 sps:$4 sm:$0xff]  }
 0x1a5   :  { %2372 = vmatpush1.bf16.msra.mxu1 %v4240_v1  ;;  %2332 = vmatprep.subr.bf16.mxu0 %v4245_v2  ;;  %v4306_v1 = vld [vmem:[#allocation6 + $0x20] ss:$8 sps:$4 sm:$0xff]   ;;  %v4311_v2 = vld [vmem:[#allocation6 + $0x14] ss:$8 sps:$4 sm:$0xff]  }
 0x1a6   :  { %2373 = vmatprep.subr.bf16.mxu1 %v4248_v3  ;;  %v4348_v3 = vld [vmem:[#allocation6 + $0x140] ss:$8 sps:$4 sm:$0xff]  }
 0x1a8   :  { %2333 = vmatpush2.bf16.msra.mxu0 %v4243_v4  ;;  %v4353_v4 = vld [vmem:[#allocation6 + $0x134] ss:$8 sps:$4 sm:$0xff]  }
 0x1a9   :  { %2374 = vmatpush2.bf16.msra.mxu1 %v4246_v5  ;;  %2334 = vmatprep.subr.bf16.mxu0 %v4251_v11  ;;  %v4309_v5 = vld [vmem:[#allocation6 + $0x10] ss:$8 sps:$4 sm:$0xff]   ;;  %v4314_v11 = vld [vmem:[#allocation6 + $0x4] ss:$8 sps:$4 sm:$0xff]  }
 0x1aa   :  { %2375 = vmatprep.subr.bf16.mxu1 %v4254_v12  ;;  %v4351_v12 = vld [vmem:[#allocation6 + $0x130] ss:$8 sps:$4 sm:$0xff]  }
 0x1ac   :  { %2335 = vmatpush2.bf16.msra.mxu0 %v4249_v13  ;;  %v4356_v13 = vld [vmem:[#allocation6 + $0x124] ss:$8 sps:$4 sm:$0xff]  }
 0x1ad   :  { %2376 = vmatpush2.bf16.msra.mxu1 %v4252_v14  ;;  %2336 = vmatprep.subr.bf16.mxu0 %v4257_v7  ;;  %v4312_v14 = vld [vmem:[#allocation6] ss:$8 sps:$4 sm:$0xff]   ;;  %v4317_v7 = vld [vmem:[#allocation6 + $0xf4] ss:$8 sps:$4 sm:$0xff]  }
 0x1ae   :  { %2377 = vmatprep.subr.bf16.mxu1 %v4260_v16  ;;  %v4354_v16 = vld [vmem:[#allocation6 + $0x120] ss:$8 sps:$4 sm:$0xff]  }
 0x1b0   :  { %2337 = vmatpush2.bf16.msra.mxu0 %v4255_v17  ;;  %v4359_v17 = vld [vmem:[#allocation6 + $0x114] ss:$8 sps:$4 sm:$0xff]  }
 0x1b1   :  { %2378 = vmatpush2.bf16.msra.mxu1 %v4258_v51  ;;  %2338 = vmatprep.subr.bf16.mxu0 %v4263_v18  ;;  %v4315_v51 = vld [vmem:[#allocation6 + $0xf0] ss:$8 sps:$4 sm:$0xff]   ;;  %v4320_v18 = vld [vmem:[#allocation6 + $0xe4] ss:$8 sps:$4 sm:$0xff]  }
 0x1b2   :  { %2379 = vmatprep.subr.bf16.mxu1 %v4266_v20  ;;  %v4357_v20 = vld [vmem:[#allocation6 + $0x110] ss:$8 sps:$4 sm:$0xff]  }
 0x1b4   :  { %2339 = vmatpush2.bf16.msra.mxu0 %v4261_v55  ;;  %v4362_v55 = vld [vmem:[#allocation6 + $0x104] ss:$8 sps:$4 sm:$0xff]  }
 0x1b5   :  { %2380 = vmatpush2.bf16.msra.mxu1 %v4264_v21  ;;  %2340 = vmatprep.subr.bf16.mxu0 %v4269_v22  ;;  %v4318_v21 = vld [vmem:[#allocation6 + $0xe0] ss:$8 sps:$4 sm:$0xff]   ;;  %v4323_v22 = vld [vmem:[#allocation6 + $0xd4] ss:$8 sps:$4 sm:$0xff]  }
 0x1b6   :  { %2381 = vmatprep.subr.bf16.mxu1 %v4272_v24  ;;  %v4360_v24 = vld [vmem:[#allocation6 + $0x100] ss:$8 sps:$4 sm:$0xff]  }
 0x1b8   :  { %2341 = vmatpush2.bf16.msra.mxu0 %v4267_v26  ;;  %v4365_v26 = vld [vmem:[#allocation6 + $0x1f4] ss:$8 sps:$4 sm:$0xff]  }
 0x1b9   :  { %2382 = vmatpush2.bf16.msra.mxu1 %v4270_v27  ;;  %2342 = vmatprep.subr.bf16.mxu0 %v4275_v28  ;;  %v4321_v27 = vld [vmem:[#allocation6 + $0xd0] ss:$8 sps:$4 sm:$0xff]   ;;  %v4326_v28 = vld [vmem:[#allocation6 + $0xc4] ss:$8 sps:$4 sm:$0xff]  }
 0x1ba   :  { %2383 = vmatprep.subr.bf16.mxu1 %v4278_v29  ;;  %v4363_v29 = vld [vmem:[#allocation6 + $0x1f0] ss:$8 sps:$4 sm:$0xff]  }
 0x1bc   :  { %2343 = vmatpush2.bf16.msra.mxu0 %v4273_v30  ;;  %v4368_v30 = vld [vmem:[#allocation6 + $0x1e4] ss:$8 sps:$4 sm:$0xff]  }
 0x1bd   :  { %2384 = vmatpush2.bf16.msra.mxu1 %v4276_v31  ;;  %2344 = vmatprep.subr.bf16.mxu0 %v4281_v32  ;;  %v4324_v31 = vld [vmem:[#allocation6 + $0xc0] ss:$8 sps:$4 sm:$0xff]   ;;  %v4329_v32 = vld [vmem:[#allocation6 + $0xb4] ss:$8 sps:$4 sm:$0xff]  }
 0x1be   :  { %2385 = vmatprep.subr.bf16.mxu1 %v4284_v33  ;;  %v4366_v33 = vld [vmem:[#allocation6 + $0x1e0] ss:$8 sps:$4 sm:$0xff]  }
 0x1c0   :  { %2345 = vmatpush2.bf16.msra.mxu0 %v4279_v35  ;;  %v4371_v35 = vld [vmem:[#allocation6 + $0x1d4] ss:$8 sps:$4 sm:$0xff]  }
 0x1c1   :  { %2386 = vmatpush2.bf16.msra.mxu1 %v4282_v36  ;;  %2346 = vmatprep.subr.bf16.mxu0 %v4287_v39  ;;  %v4327_v36 = vld [vmem:[#allocation6 + $0xb0] ss:$8 sps:$4 sm:$0xff]   ;;  %v4332_v39 = vld [vmem:[#allocation6 + $0xa4] ss:$8 sps:$4 sm:$0xff]  }
 0x1c2   :  { %2387 = vmatprep.subr.bf16.mxu1 %v4290_v34  ;;  %v4369_v34 = vld [vmem:[#allocation6 + $0x1d0] ss:$8 sps:$4 sm:$0xff]  }
 0x1c4   :  { %2347 = vmatpush2.bf16.msra.mxu0 %v4285_v40  ;;  %v4374_v40 = vld [vmem:[#allocation6 + $0x1c4] ss:$8 sps:$4 sm:$0xff]  }
 0x1c5   :  { %2388 = vmatpush2.bf16.msra.mxu1 %v4288_v42  ;;  %2810 = vmatprep.subr.bf16.mxu0 %v4293_v38  ;;  %v4330_v42 = vld [vmem:[#allocation6 + $0xa0] ss:$8 sps:$4 sm:$0xff]   ;;  %v4335_v38 = vld [vmem:[#allocation6 + $0x94] ss:$8 sps:$4 sm:$0xff]  }
 0x1c7   :  { %2349 = vmatmul.mubr.bf16.vlgmr.msra.gmra.mxu0 %v4625_v23  ;;  %v4638_v45 = vpop.f32.mrf.mxu0  ;;  %v4302_v23 = vld [vmem:[#allocation6 + $0x44] ss:$8 sps:$4 sm:$0xff]  }
 0x1c8   :  { %2390 = vmatmul.mubr.bf16.vlgmr.msra.gmra.mxu1 %v4627_v25  ;;  %v4641_v37 = vpop.f32.mrf.mxu1  ;;  %2811 = vmatpush1.bf16.msra.mxu0 %v4291_v43  ;;  %v4341_v25 = vld [vmem:[#allocation6 + $0x174] ss:$8 sps:$4 sm:$0xff]   ;;  %v4372_v43 = vld [vmem:[#allocation6 + $0x1c0] ss:$8 sps:$4 sm:$0xff]  }
 0x1c9   :  { %v4643_v41 = vpop.f32.mrf.mxu0  ;;  %2812 = vmatprep.subr.bf16.mxu0 %v4296_v44  ;;  %2851 = vmatprep.subr.bf16.mxu1 %v4341_v25  ;;  %v4377_v44 = vld [vmem:[#allocation6 + $0x1b4] ss:$8 sps:$4 sm:$0xff]  }
 0x1ca   :  { %v4645_v15 = vpop.f32.mrf.mxu1  ;;  %2852 = vmatpush1.bf16.msra.mxu1 %v4339_v53 }
 0x1cb   :  { %v2108_v48 = vpop.f32.mrf.mxu0  ;;  %2853 = vmatprep.subr.bf16.mxu1 %v4344_v54 }
 0x1cc   :  { %v2149_v49 = vpop.f32.mrf.mxu1  ;;  %2813 = vmatpush1.bf16.msra.mxu0 %v4294_v46  ;;  %v4650_v46 = vld [vmem:[%s4815_s9 + $0x8] sm:$0xf]  ;;  %v4338_v48 = vld [vmem:[#allocation6 + $0x84] ss:$8 sps:$4 sm:$0xff]  }
 0x1cd   :  { %v2109_v50 = vpop.f32.mrf.mxu0  ;;  %2814 = vmatprep.subr.bf16.mxu0 %v4299_v47  ;;  %v4333_v47 = vld [vmem:[#allocation6 + $0x90] ss:$8 sps:$4 sm:$0xff]  }
 0x1ce   :  { %v2150_v52 = vpop.f32.mrf.mxu1  ;;  %2854 = vmatpush1.bf16.msra.mxu1 %v4342_v58  ;;  %v4375_v49 = vld [vmem:[#allocation6 + $0x1b0] ss:$8 sps:$4 sm:$0xff]   ;;  %v777_v50 = vrot.slane %v4650_v46, %v4580_v9 }
 0x1cf   :  { %2855 = vmatprep.subr.bf16.mxu1 %v4347_v59  ;;  %v4380_v59 = vld [vmem:[#allocation6 + $0x1a4] ss:$8 sps:$4 sm:$0xff]  }
 0x1d0   :  { %2815 = vmatpush1.bf16.msra.mxu0 %v4297_v19  ;;  %v773_v19 = vrot.slane %v4650_v46, %v4571_v6  ;;  %v2107_v53 = vadd.f32 %v4643_v41, %v777_v50 }
 0x1d1   :  { %2816 = vmatprep.subr.bf16.mxu0 %v4302_v23  ;;  %v4336_v23 = vld [vmem:[#allocation6 + $0x80] ss:$8 sps:$4 sm:$0xff]  }
 0x1d2   :  { %2856 = vmatpush1.bf16.msra.mxu1 %v4345_v62  ;;  %v2105_v52 = vadd.f32 %v4638_v45, %v773_v19 }
 0x1d3   :  { %2857 = vmatprep.subr.bf16.mxu1 %v4350_v63 }
 0x1d4   :  { %2817 = vmatpush1.bf16.msra.mxu0 %v4300_v56  ;;  %v2146_v25 = vadd.f32 %v4641_v37, %v2105_v52  ;;  %v2148_v56 = vadd.f32 %v4645_v15, %v2107_v53 }
 0x1d5   :  { %2818 = vmatprep.subr.bf16.mxu0 %v4305_v57 }
 0x1d6   :  { %2858 = vmatpush1.bf16.msra.mxu1 %v4348_v3 }
 0x1d7   :  { %2859 = vmatprep.subr.bf16.mxu1 %v4353_v4  ;;  %v4383_v4 = vld [vmem:[#allocation6 + $0x194] ss:$8 sps:$4 sm:$0xff]  }
 0x1d8   :  { %2819 = vmatpush1.bf16.msra.mxu0 %v4303_v60 }
 0x1d9   :  { %2820 = vmatprep.subr.bf16.mxu0 %v4308_v61  ;;  %v4378_v61 = vld [vmem:[#allocation6 + $0x1a0] ss:$8 sps:$4 sm:$0xff]  }
 0x1da   :  { %2860 = vmatpush1.bf16.msra.mxu1 %v4351_v12 }
 0x1db   :  { %2861 = vmatprep.subr.bf16.mxu1 %v4356_v13  ;;  %v4384_v13 = vld [vmem:[#allocation6 + $0x180] ss:$8 sps:$4 sm:$0xff]  }
 0x1dc   :  { %2821 = vmatpush1.bf16.msra.mxu0 %v4306_v1 }
 0x1dd   :  { %2822 = vmatprep.subr.bf16.mxu0 %v4311_v2 }
 0x1de   :  { %2862 = vmatpush1.bf16.msra.mxu1 %v4354_v16 }
 0x1df   :  { %2863 = vmatprep.subr.bf16.mxu1 %v4359_v17 }
 0x1e0   :  { %2823 = vmatpush1.bf16.msra.mxu0 %v4309_v5  ;;  %v4381_v5 = vld [vmem:[#allocation6 + $0x190] ss:$8 sps:$4 sm:$0xff]  }
 0x1e1   :  { %2824 = vmatprep.subr.bf16.mxu0 %v4314_v11 }
 0x1e2   :  { %2864 = vmatpush1.bf16.msra.mxu1 %v4357_v20 }
 0x1e3   :  { %2865 = vmatprep.subr.bf16.mxu1 %v4362_v55 }
 0x1e4   :  { %2825 = vmatpush1.bf16.msra.mxu0 %v4312_v14  ;;  %v4386_v14 = vld [vmem:[#allocation6 + $0x184] ss:$8 sps:$4 sm:$0xff]  }
 0x1e5   :  { %2826 = vmatprep.subr.bf16.mxu0 %v4317_v7 }
 0x1e6   :  { %2866 = vmatpush1.bf16.msra.mxu1 %v4360_v24 }
 0x1e7   :  { %2867 = vmatprep.subr.bf16.mxu1 %v4365_v26 }
 0x1e8   :  { %2827 = vmatpush2.bf16.msra.mxu0 %v4315_v51 }
 0x1e9   :  { %2828 = vmatprep.subr.bf16.mxu0 %v4320_v18 }
 0x1ea   :  { %2868 = vmatpush2.bf16.msra.mxu1 %v4363_v29  ;;  %v4389_v29 = vld [vmem:[%s4810_s4 + $0x70] sm:$0xff]  }
 0x1eb   :  { %2869 = vmatprep.subr.bf16.mxu1 %v4368_v30  ;;  %v4390_v30 = vld [vmem:[%s4810_s4 + $0x30] sm:$0xff]  }
 0x1ec   :  { %2829 = vmatpush2.bf16.msra.mxu0 %v4318_v21 }
 0x1ed   :  { %2830 = vmatprep.subr.bf16.mxu0 %v4323_v22 }
 0x1ee   :  { %2870 = vmatpush2.bf16.msra.mxu1 %v4366_v33  ;;  %v4393_v33 = vld [vmem:[%s4810_s4 + $0x60] sm:$0xff]  }
 0x1ef   :  { %2871 = vmatprep.subr.bf16.mxu1 %v4371_v35  ;;  %v4394_v35 = vld [vmem:[%s4810_s4 + $0x20] sm:$0xff]  }
 0x1f0   :  { %2831 = vmatpush2.bf16.msra.mxu0 %v4321_v27  ;;  %v4387_v27 = vld [vmem:[%s4810_s4 + $0x78] sm:$0xff]  }
 0x1f1   :  { %2832 = vmatprep.subr.bf16.mxu0 %v4326_v28  ;;  %v4388_v28 = vld [vmem:[%s4810_s4 + $0x38] sm:$0xff]  }
 0x1f2   :  { %2872 = vmatpush2.bf16.msra.mxu1 %v4369_v34  ;;  %v4397_v34 = vld [vmem:[%s4810_s4 + $0x50] sm:$0xff]  }
 0x1f3   :  { %2873 = vmatprep.subr.bf16.mxu1 %v4374_v40  ;;  %v781_v40 = vrot.slane %v4650_v46, %v122_v8 }
 0x1f4   :  { %2833 = vmatpush2.bf16.msra.mxu0 %v4324_v31  ;;  %v4391_v31 = vld [vmem:[%s4810_s4 + $0x68] sm:$0xff]  }
 0x1f5   :  { %2834 = vmatprep.subr.bf16.mxu0 %v4329_v32  ;;  %v4392_v32 = vld [vmem:[%s4810_s4 + $0x28] sm:$0xff]  }
 0x1f6   :  { %2874 = vmatpush2.bf16.msra.mxu1 %v4372_v43 }
 0x1f7   :  { %2875 = vmatprep.subr.bf16.mxu1 %v4377_v44 }
 0x1f8   :  { %2835 = vmatpush2.bf16.msra.mxu0 %v4327_v36  ;;  %v4395_v36 = vld [vmem:[%s4810_s4 + $0x58] sm:$0xff]  }
 0x1f9   :  { %2836 = vmatprep.subr.bf16.mxu0 %v4332_v39  ;;  %v4396_v39 = vld [vmem:[%s4810_s4 + $0x18] sm:$0xff]  }
 0x1fa   :  { %2876 = vmatpush2.bf16.msra.mxu1 %v4375_v49 }
 0x1fb   :  { %2877 = vmatprep.subr.bf16.mxu1 %v4380_v59 }
 0x1fc   :  { %2837 = vmatpush2.bf16.msra.mxu0 %v4330_v42  ;;  %v785_v42 = vrot.slane %v4650_v46, %v126_v10 }
 0x1fd   :  { %2838 = vmatprep.subr.bf16.mxu0 %v4335_v38 }
 0x1fe   :  { %2878 = vmatpush2.bf16.msra.mxu1 %v4378_v61 }
 0x1ff   :  { %2879 = vmatprep.subr.bf16.mxu1 %v4383_v4  ;;  %v4402_v4 = vld [vmem:[%s4810_s4] sm:$0xff]  }
 0x200   :  { %2839 = vmatpush2.bf16.msra.mxu0 %v4333_v47 }
 0x201   :  { %2840 = vmatprep.subr.bf16.mxu0 %v4338_v48 }
 0x202   :  { %2880 = vmatpush2.bf16.msra.mxu1 %v4381_v5  ;;  %v4491_v5 = vmov 0.0  }
 0x203   :  { %2881 = vmatprep.subr.bf16.mxu1 %v4386_v14  ;;  %v2414_v14 = vld [vmem:[%s4815_s9 + $0xc] sm:$0x3] }
 0x204   :  { %2841 = vmatpush2.bf16.msra.mxu0 %v4336_v23 }
 0x205   :  { %3808 = vmatprep.subr.bf16.mxu0 %v4387_v27 }
 0x206   :  { %2882 = vmatpush2.bf16.msra.mxu1 %v4384_v13  ;;  %v4407_v13 = vld [vmem:[%s4811_s5 + $0x18] sm:$0xff]  }
 0x207   :  { %v2186_v54 = vpop.f32.mrf.mxu0  ;;  %3849 = vmatprep.subr.bf16.mxu1 %v4491_v5 }
 0x208   :  { %v2187_v57 = vadd.f32 %v2186_v54, %v2146_v25  ;;  %v2227_v58 = vpop.f32.mrf.mxu1 }
 0x209   :  { %v2188_v60 = vpop.f32.mrf.mxu0 }
 0x20a   :  { %v2228_v62 = vadd.f32 %v2227_v58, %v2187_v57  ;;  %v2189_v63 = vadd.f32 %v2188_v60, %v2148_v56  ;;  %v2229_v1 = vpop.f32.mrf.mxu1 }
 0x20b   :  { %v2190_v2 = vpop.f32.mrf.mxu0 }
 0x20c   :  { %vm2398_vm9 = vcmp.ge.f32.partialorder %v2228_v62, 0.0  ;;  %v2402_v45 = vmul.f32 0.01, %v2228_v62  ;;  %v2230_v41 = vadd.f32 %v2229_v1, %v2189_v63  ;;  %v2231_v3 = vpop.f32.mrf.mxu1  ;;  %v4399_v1 = vld [vmem:[%s4810_s4 + $0x48] sm:$0xff]  }
 0x20d   :  { %v2191_v37 = vpop.f32.mrf.mxu0  ;;  %v4401_v3 = vld [vmem:[%s4810_s4 + $0x40] sm:$0xff]  }
 0x20e   :  { %vm2399_vm10 = vcmp.ge.f32.partialorder %v2230_v41, 0.0  ;;  %v2403_v15 = vmul.f32 0.01, %v2230_v41  ;;  %v2232_v11 = vpop.f32.mrf.mxu1  ;;  %v2406_v12 = vsel %vm2398_vm9, %v2228_v62, %v2402_v45  ;;  %v4398_v62 = vld [vmem:[%s4810_s4 + $0x10] sm:$0xff]   ;;  %v4400_v45 = vld [vmem:[%s4810_s4 + $0x8] sm:$0xff]   ;;  %v4403_v37 = vld [vmem:[%s4811_s5 + $0x38] sm:$0xff]  }
 0x20f   :  { %v2410_v17 = vpack.c.bf16 %v2406_v12, %v2406_v12  ;;  %v4405_v11 = vld [vmem:[%s4811_s5 + $0x28] sm:$0xff]   ;;  %v4406_v12 = vld [vmem:[%s4811_s5 + $0x20] sm:$0xff]  }
 0x210   :  { %v2407_v7 = vsel %vm2399_vm10, %v2230_v41, %v2403_v15  ;;  %v4404_v15 = vld [vmem:[%s4811_s5 + $0x30] sm:$0xff]  }
 0x211   :  { %v2411_v16 = vpack.c.bf16 %v2407_v7, %v2407_v7  ;;  %v2483_v7 = vrot.slane %v2414_v14, %v4571_v6  ;;  %v4408_v6 = vld [vmem:[%s4811_s5 + $0x10] sm:$0xff]  }
 0x213   :  { %2842 = vmatprep.mubr.bf16.mxu0 %v2411_v16  ;;  %v2487_v16 = vrot.slane %v2414_v14, %v4580_v9  ;;  %v4409_v9 = vld [vmem:[%s4811_s5 + $0x8] sm:$0xff]  }
 0x214   :  { %2843 = vmatmul.mubr.bf16.vlgmr.msra.gmra.mxu0 %v2410_v17 }
 0x215   :  { %3809 = vmatpush3.bf16.msra.mxu0 %v4388_v28 }
 0x216   :  { %3810 = vmatprep.subr.bf16.mxu0 %v4389_v29 }
 0x219   :  { %3811 = vmatpush3.bf16.msra.mxu0 %v4390_v30 }
 0x21a   :  { %3812 = vmatprep.subr.bf16.mxu0 %v4391_v31 }
 0x21d   :  { %3813 = vmatpush3.bf16.msra.mxu0 %v4392_v32  ;;  %v4410_v32 = vld [vmem:[%s4811_s5] sm:$0xff]  }
 0x21e   :  { %3814 = vmatprep.subr.bf16.mxu0 %v4393_v33  ;;  %v4411_v33 = vld [vmem:[%s4812_s6 + $0x18] sm:$0xff]  }
 0x221   :  { %3815 = vmatpush3.bf16.msra.mxu0 %v4394_v35  ;;  %v4412_v35 = vld [vmem:[%s4812_s6 + $0x10] sm:$0xff]  }
 0x222   :  { %3816 = vmatprep.subr.bf16.mxu0 %v4395_v36 }
 0x225   :  { %3817 = vmatpush3.bf16.msra.mxu0 %v4396_v39  ;;  %v3770_v39 = vld [vmem:[%s4815_s9 + $0xe] ss:$0 sm:$0xff] }
 0x226   :  { %3818 = vmatprep.subr.bf16.mxu0 %v4397_v34 }
 0x229   :  { %3819 = vmatpush3.bf16.msra.mxu0 %v4398_v62 }
 0x22a   :  { %3820 = vmatprep.subr.bf16.mxu0 %v4399_v1 }
 0x22d   :  { %3821 = vmatpush3.bf16.msra.mxu0 %v4400_v45  ;;  %v3352_v45 = vld [vmem:[%s4814_s8] sm:$0xf] }
 0x22e   :  { %3822 = vmatprep.subr.bf16.mxu0 %v4401_v3  ;;  %v3802_v3 = vld [vmem:[%s4815_s9 + $0x11] ss:$0 sm:$0xff] }
 0x231   :  { %3823 = vmatpush3.bf16.msra.mxu0 %v4402_v4 }
 0x232   :  { %3869 = vmatprep.subr.bf16.mxu0 %v4491_v5 }
 0x247   :  { %v2268_v51 = vpop.f32.mrf.mxu0 }
 0x248   :  { %v2309_v18 = vpop.f32.mrf.mxu1  ;;  %v2269_v38 = vadd.f32 %v2268_v51, %v781_v40 }
 0x249   :  { %v2270_v20 = vpop.f32.mrf.mxu0 }
 0x24a   :  { %v2311_v55 = vpop.f32.mrf.mxu1  ;;  %v2271_v43 = vadd.f32 %v2270_v20, %v785_v42  ;;  %v2310_v44 = vadd.f32 %v2309_v18, %v2269_v38 }
 0x24b   :  { %v2272_v21 = vpop.f32.mrf.mxu0 }
 0x24c   :  { %v2313_v22 = vpop.f32.mrf.mxu1  ;;  %v2312_v48 = vadd.f32 %v2311_v55, %v2271_v43 }
 0x24d   :  { %v2273_v24 = vpop.f32.mrf.mxu0 }
 0x24e   :  { %v2314_v26 = vpop.f32.mrf.mxu1 }
 0x287   :  { %v2350_v47 = vpop.f32.mrf.mxu0 }
 0x288   :  { %v2351_v49 = vadd.f32 %v2350_v47, %v2310_v44  ;;  %v2391_v19 = vpop.f32.mrf.mxu1 }
 0x289   :  { %v2352_v50 = vpop.f32.mrf.mxu0 }
 0x28a   :  { %v2392_v23 = vadd.f32 %v2391_v19, %v2351_v49  ;;  %v2353_v52 = vadd.f32 %v2352_v50, %v2312_v48  ;;  %v2393_v53 = vpop.f32.mrf.mxu1  ;;  %v4413_v49 = vld [vmem:[%s4812_s6 + $0x8] sm:$0xff]   ;;  %v4414_v19 = vld [vmem:[%s4812_s6] sm:$0xff]  }
 0x28b   :  { %v2354_v25 = vpop.f32.mrf.mxu0  ;;  %v3787_v50 = vld [vmem:[%s4815_s9 + $0xf] ss:$0 sm:$0xff] }
 0x28c   :  { %vm2400_vm11 = vcmp.ge.f32.partialorder %v2392_v23, 0.0  ;;  %v2404_v54 = vmul.f32 0.01, %v2392_v23  ;;  %v2394_v56 = vadd.f32 %v2393_v53, %v2353_v52  ;;  %v2395_v8 = vpop.f32.mrf.mxu1 }
 0x28d   :  { %v2355_v57 = vpop.f32.mrf.mxu0 }
 0x28e   :  { %vm2401_vm12 = vcmp.ge.f32.partialorder %v2394_v56, 0.0  ;;  %v2405_v0 = vmul.f32 0.01, %v2394_v56  ;;  %v2396_v10 = vpop.f32.mrf.mxu1  ;;  %v2408_v46 = vsel %vm2400_vm11, %v2392_v23, %v2404_v54 }
 0x28f   :  { %v2412_v60 = vpack.c.bf16 %v2408_v46, %v2408_v46  ;;  %v4416_v10 = vld [vmem:[%s4813_s7] sm:$0xff]   ;;  %v3796_v46 = vld [vmem:[%s4815_s9 + $0x10] ss:$0 sm:$0xff] }
 0x290   :  { %v2409_v58 = vsel %vm2401_vm12, %v2394_v56, %v2405_v0  ;;  %v4415_v0 = vld [vmem:[%s4813_s7 + $0x8] sm:$0xff]  }
 0x291   :  { %v2413_v59 = vpack.c.bf16 %v2409_v58, %v2409_v58 }
 0x293   :  { %2883 = vmatprep.mubr.bf16.mxu1 %v2413_v59 }
 0x294   :  { %2884 = vmatmul.mubr.bf16.vlgmr.msra.gmra.mxu1 %v2412_v60 }
 0x295   :  { %3850 = vmatpush3.bf16.msra.mxu1 %v4403_v37  ;;  %3865 = vmatprep.mubr.msk.bf16.mxu1 %vm4492_vm15, %v4491_v5 }
 0x296   :  { %3851 = vmatprep.subr.bf16.mxu1 %v4491_v5 }
 0x299   :  { %3852 = vmatpush3.bf16.msra.mxu1 %v4404_v15 }
 0x29a   :  { %3853 = vmatprep.subr.bf16.mxu1 %v4491_v5 }
 0x29d   :  { %3854 = vmatpush3.bf16.msra.mxu1 %v4405_v11 }
 0x29e   :  { %3855 = vmatprep.subr.bf16.mxu1 %v4491_v5 }
 0x2a1   :  { %3856 = vmatpush3.bf16.msra.mxu1 %v4406_v12 }
 0x2a2   :  { %3857 = vmatprep.subr.bf16.mxu1 %v4491_v5 }
 0x2a5   :  { %3858 = vmatpush3.bf16.msra.mxu1 %v4407_v13 }
 0x2a6   :  { %3859 = vmatprep.subr.bf16.mxu1 %v4491_v5 }
 0x2a9   :  { %3860 = vmatpush3.bf16.msra.mxu1 %v4408_v6 }
 0x2aa   :  { %3861 = vmatprep.subr.bf16.mxu1 %v4491_v5 }
 0x2ad   :  { %3862 = vmatpush3.bf16.msra.mxu1 %v4409_v9 }
 0x2ae   :  { %3863 = vmatprep.subr.bf16.mxu1 %v4491_v5 }
 0x2b1   :  { %3864 = vmatpush3.bf16.msra.mxu1 %v4410_v32 }
 0x2b2   :  { %3881 = vmatprep.subr.bf16.mxu1 %v4491_v5 }
 0x2d4   :  { %v2844_v61 = vpop.f32.mrf.mxu0 }
 0x2d5   :  { %v2845_v17 = vadd.f32 %v2844_v61, %v2483_v7  ;;  %v3806_v7 = vld [vmem:[%s4815_s9 + $0x12] ss:$0 sm:$0xff] }
 0x2d6   :  { %v2846_v63 = vpop.f32.mrf.mxu0 }
 0x2d7   :  { %v2847_v18 = vadd.f32 %v2846_v63, %v2487_v16 }
 0x2d8   :  { %v2848_v2 = vpop.f32.mrf.mxu0 }
 0x2da   :  { %v2849_v41 = vpop.f32.mrf.mxu0 }
 0x2db   :  { %v3365_v41 = vsel %vm3363_vm4, %v3352_v45, 0 }
 0x354   :  { %v2885_v51 = vpop.f32.mrf.mxu1 }
 0x355   :  { %v2886_v20 = vadd.f32 %v2885_v51, %v2845_v17 }
 0x356   :  { %v2887_v55 = vpop.f32.mrf.mxu1 }
 0x357   :  { %vm2892_vm13 = vcmp.ge.f32.partialorder %v2886_v20, 0.0  ;;  %v2894_v21 = vmul.f32 0.01, %v2886_v20  ;;  %v2888_v22 = vadd.f32 %v2887_v55, %v2847_v18 }
 0x358   :  { %v2889_v24 = vpop.f32.mrf.mxu1 }
 0x359   :  { %vm2893_vm14 = vcmp.ge.f32.partialorder %v2888_v22, 0.0  ;;  %v2895_v26 = vmul.f32 0.01, %v2888_v22  ;;  %v2896_v27 = vsel %vm2892_vm13, %v2886_v20, %v2894_v21 }
 0x35a   :  { %v2890_v28 = vpop.f32.mrf.mxu1  ;;  %v2898_v31 = vpack.c.bf16 %v2896_v27, %v2896_v27 }
 0x35b   :  { %v2897_v29 = vsel %vm2893_vm14, %v2888_v22, %v2895_v26 }
 0x35c   :  { %v2899_v30 = vpack.c.bf16 %v2897_v29, %v2897_v29 }
 0x35e   :  { %3067 = vmatprep.mubr.bf16.mxu0 %v2899_v30 }
 0x35f   :  { %3068 = vmatmul.mubr.bf16.vlgmr.msra.gmra.mxu0 %v2898_v31 }
 0x360   :  { %3877 = vmatprep.mubr.msk.bf16.mxu0 %vm4492_vm15, %v4491_v5  ;;  %3870 = vmatpush3.bf16.msra.mxu0 %v4411_v33 }
 0x361   :  { %3871 = vmatprep.subr.bf16.mxu0 %v4491_v5 }
 0x364   :  { %3872 = vmatpush3.bf16.msra.mxu0 %v4412_v35 }
 0x365   :  { %3873 = vmatprep.subr.bf16.mxu0 %v4491_v5 }
 0x368   :  { %3874 = vmatpush3.bf16.msra.mxu0 %v4413_v49 }
 0x369   :  { %3875 = vmatprep.subr.bf16.mxu0 %v4491_v5 }
 0x36c   :  { %3876 = vmatpush3.bf16.msra.mxu0 %v4414_v19 }
 0x41f   :  { %v3824_v36 = vpop.f32.mrf.mxu0 }
 0x421   :  { %v3825_v34 = vpop.f32.mrf.mxu0 }
 0x422   :  { %v3826_v40 = vadd.f32 %v3825_v34, %v3824_v36 }
 0x423   :  { %v3827_v42 = vpop.f32.mrf.mxu0 }
 0x424   :  { %v3070_v38 = vadd.f32 %v3826_v40, %v3770_v39 }
 0x425   :  { %v3828_v43 = vpop.f32.mrf.mxu0 }
 0x426   :  { %vm3075_vm1 = vcmp.ge.f32.partialorder %v3070_v38, 0.0  ;;  %v3076_v44 = vmul.f32 0.01, %v3070_v38 }
 0x428   :  { %v3077_v47 = vsel %vm3075_vm1, %v3070_v38, %v3076_v44 }
 0x429   :  { %v3078_v48 = vpack.c.bf16 %v3077_v47, %v3077_v47 }
 0x42b   :  { %3866 = vmatmul.mubr.bf16.vlgmr.msra.gmra.mxu1 %v3078_v48 }
 0x42c   :  { %3885 = vmatprep.mubr.msk.bf16.mxu1 %vm4492_vm15, %v4491_v5  ;;  %3882 = vmatpush3.bf16.msra.mxu1 %v4415_v0 }
 0x42d   :  { %3883 = vmatprep.subr.bf16.mxu1 %v4491_v5 }
 0x430   :  { %3884 = vmatpush3.bf16.msra.mxu1 %v4416_v10 }
 0x431   :  { %3889 = vmatprep.subr.bf16.mxu1 %v4491_v5 }
 0x4eb   :  { %v3184_v23 = vpop.f32.mrf.mxu1 }
 0x4ec   :  { %v3185_v52 = vadd.f32 %v3787_v50, %v3184_v23 }
 0x4ed   :  { %v3867_v53 = vpop.f32.mrf.mxu1 }
 0x4ee   :  { %vm3190_vm2 = vcmp.ge.f32.partialorder %v3185_v52, 0.0  ;;  %v3191_v25 = vmul.f32 0.01, %v3185_v52 }
 0x4ef   :  { %v3187_v54 = vpop.f32.mrf.mxu1 }
 0x4f0   :  { %v3192_v56 = vsel %vm3190_vm2, %v3185_v52, %v3191_v25 }
 0x4f1   :  { %v3193_v8 = vpack.c.bf16 %v3192_v56, %v3192_v56  ;;  %v3868_v57 = vpop.f32.mrf.mxu1 }
 0x4f3   :  { %3878 = vmatmul.mubr.msk.bf16.vlgmr.msra.gmra.mxu0 %vm312_vm0, %v3193_v8 }
 0x5b3   :  { %v3270_v58 = vpop.f32.mrf.mxu0 }
 0x5b4   :  { %v3271_v59 = vadd.f32 %v3796_v46, %v3270_v58 }
 0x5b5   :  { %v3879_v60 = vpop.f32.mrf.mxu0 }
 0x5b6   :  { %vm3276_vm0 = vcmp.ge.f32.partialorder %v3271_v59, 0.0  ;;  %v3277_v61 = vmul.f32 0.01, %v3271_v59 }
 0x5b7   :  { %v3273_v62 = vpop.f32.mrf.mxu0 }
 0x5b8   :  { %v3278_v63 = vsel %vm3276_vm0, %v3271_v59, %v3277_v61 }
 0x5b9   :  { %v3279_v1 = vpack.c.bf16 %v3278_v63, %v3278_v63  ;;  %v3880_v2 = vpop.f32.mrf.mxu0 }
 0x5bb   :  { %3886 = vmatmul.mubr.msk.bf16.vlgmr.msra.gmra.mxu1 %vm3303_vm3, %v3279_v1 }
 0x5bc   :  { %3891 = vmatprep.mubr.msk.bf16.mxu1 %vm4492_vm15, %v4491_v5  ;;  %3890 = vmatpush3.bf16.msra.mxu1 %v3365_v41 }
 0x67b   :  { %v3341_v4 = vpop.f32.mrf.mxu1 }
 0x67c   :  { %v3342_v37 = vadd.f32 %v3802_v3, %v3341_v4 }
 0x67d   :  { %v3887_v15 = vpop.f32.mrf.mxu1 }
 0x67e   :  { %vm3347_vm5 = vcmp.ge.f32.partialorder %v3342_v37, 0.0  ;;  %v3348_v11 = vmul.f32 0.01, %v3342_v37 }
 0x67f   :  { %v3344_v12 = vpop.f32.mrf.mxu1 }
 0x680   :  { %v3349_v13 = vsel %vm3347_vm5, %v3342_v37, %v3348_v11 }
 0x681   :  { %v3350_v5 = vpack.c.bf16 %v3349_v13, %v3349_v13  ;;  %v3888_v14 = vpop.f32.mrf.mxu1 }
 0x683   :  { %3892 = vmatmul.mubr.msk.bf16.vlgmr.msra.gmra.mxu1 %vm3359_vm6, %v3350_v5 }
 0x743   :  { %v3401_v16 = vpop.f32.mrf.mxu1 }
 0x744   :  { %v3402_v17 = vadd.f32 %v3806_v7, %v3401_v16 }
 0x745   :  { %v3893_v51 = vpop.f32.mrf.mxu1 }
 0x746   :  { %3407 = vst [vmem:[%s4816_s10] sm:$0xff] %v3402_v17 }
 0x747   :  { %v3404_v18 = vpop.f32.mrf.mxu1 }
 0x749   :  { %v3894_v20 = vpop.f32.mrf.mxu1 }
 0x74a   :  { %3412 = vsyncpa [#allocation3], 1 }
 0x74b   :  { %3413 = vsyncpa [#allocation5], 1 }

</bundles_post_ra>
